<compile_context>
chip_gen: v7x
topology: tpu7x:2x2x1
jax: 0.10.0
libtpu: 0.0.40
codegen_flags: <defaults>
</compile_context>

<pallas_src>
import math
import functools

import jax
import jax.numpy as jnp
from jax import lax
from jax.experimental import pallas as pl
from jax.experimental.pallas import tpu as pltpu


# ----------------------------------------------------------------------------
# Tiling heuristics
# ----------------------------------------------------------------------------
def _choose_head_block(heads_num, per_head_size, target=256):
    """Smallest divisor h_blk of heads_num with h_blk*d >= target; else all heads."""
    for hb in range(1, heads_num + 1):
        if heads_num % hb == 0 and hb * per_head_size >= target:
            return hb
    return heads_num


def _choose_q_block(seq_len, max_tq=512):
    """Query-tile size: full S when small, else the largest divisor of S <= max_tq (multiple of 8)."""
    if seq_len <= max_tq:
        return seq_len
    for tq in range(max_tq, 0, -8):
        if seq_len % tq == 0:
            return tq
    return seq_len


def _vmem_limit_bytes(S, H, TQ, hd, h_blk, fuse_kv, has_pb, mxu_dtype):
    isz = jnp.dtype(mxu_dtype).itemsize
    in_items = (TQ * H                                   # query tile
                + (1 if fuse_kv else 2) * S * H          # key/value activations
                + TQ * S                                 # mask tile
                + (h_blk * TQ * S if has_pb else 0)      # position-bias tile
                + 4 * H * hd + 3 * hd + H)               # weight/bias tiles
    est = (2 * in_items * isz                            # double-buffered input blocks
           + 2 * TQ * H * 4                              # double-buffered output block
           + TQ * H * 4                                  # f32 accumulator scratch
           + 4 * (2 * S * hd + 3 * TQ * hd + 4 * TQ * S + TQ * H))  # f32 temporaries
    try:
        cap = int(pltpu.get_tpu_info().vmem_capacity_bytes)
    except Exception:
        cap = 64 * 1024 * 1024                           # conservative (v7x per-TC)
    return int(min(0.75 * cap, max(32 * 1024 * 1024, 2 * est)))


# ----------------------------------------------------------------------------
# Parameter preparation (do once per model; pure layout plumbing)
# ----------------------------------------------------------------------------
def prepare_params(params, heads_num, per_head_size, head_block=None,
                   mxu_dtype=jnp.float32):
    """Re-layout nn.Linear params into head-block-major, MXU-dtype tiles.

    Returns a dict usable via multi_headed_attention(..., prepared_params=prepared).
    """
    wq, bq, wk, bk, wv, bv, wo, bo = params
    h, d = heads_num, per_head_size
    h_blk = head_block or _choose_head_block(h, d)
    assert h % h_blk == 0, "head_block must divide heads_num"
    n_hb = h // h_blk
    hd = h_blk * d
    H = wq.shape[1]

    def blockify(w):  # [h*d, H] -> [n_hb, H, h_blk*d]   (transpose-free in-kernel dots)
        return w.reshape(n_hb, hd, H).transpose(0, 2, 1).astype(mxu_dtype)

    wq_h = blockify(wq)
    wkv_h = jnp.concatenate([blockify(wk), blockify(wv)], axis=-1)      # [n_hb, H, 2*hd]
    bq_h = bq.reshape(n_hb, 1, hd).astype(jnp.float32)
    bkv_h = jnp.concatenate([bk.reshape(n_hb, 1, hd),
                             bv.reshape(n_hb, 1, hd)], axis=-1).astype(jnp.float32)
    wo_h = wo.T.reshape(n_hb, hd, H).astype(mxu_dtype)                  # [n_hb, hd, H]
    bo2 = bo.reshape(1, H).astype(jnp.float32)
    return dict(wq=wq_h, bq=bq_h, wkv=wkv_h, bkv=bkv_h, wo=wo_h, bo=bo2,
                head_block=h_blk, mxu_dtype=mxu_dtype)


# ----------------------------------------------------------------------------
# Kernel
# ----------------------------------------------------------------------------
def _make_mha_kernel(*, fuse_kv, has_pb, h_blk, d, with_scale, mxu_dtype, exp_dtype):
    hd = h_blk * d
    scale = 1.0 / math.sqrt(float(d))

    def kernel(*refs):
        it = iter(refs)
        xq_ref = next(it)                                # (1, TQ, H)   mxu_dtype
        if fuse_kv:
            xkv_ref = next(it)                           # (1, S, H)
        else:
            xk_ref = next(it)                            # (1, S, H)
            xv_ref = next(it)                            # (1, S, H)
        mask_ref = next(it)                              # (1, 1, TQ, S)
        pb_ref = next(it) if has_pb else None            # (1, h_blk, TQ, S)
        wq_ref = next(it)                                # (1, H, hd)
        bq_ref = next(it)                                # (1, 1, hd)   f32
        wkv_ref = next(it)                               # (1, H, 2*hd)
        bkv_ref = next(it)                               # (1, 1, 2*hd) f32
        wo_ref = next(it)                                # (1, hd, H)
        bo_ref = next(it)                                # (1, H)       f32
        out_ref = next(it)                               # (1, TQ, H)   f32
        acc_ref = next(it)                               # (TQ, H)      f32 scratch

        hb = pl.program_id(2)

        # --- Head-block projections (wide MXU dots, f32 accumulation + f32 bias) ---
        q = jnp.dot(xq_ref[0], wq_ref[0],
                    preferred_element_type=jnp.float32) + bq_ref[0]          # [TQ, hd]

        wkv = wkv_ref[0]
        bkv = bkv_ref[0]
        if fuse_kv:
            # One fused pass for K and V (N = 2*hd) when key is value.
            kv = jnp.dot(xkv_ref[0], wkv,
                         preferred_element_type=jnp.float32) + bkv           # [S, 2*hd]
            k = kv[:, :hd]
            v = kv[:, hd:]
        else:
            k = jnp.dot(xk_ref[0], wkv[:, :hd],
                        preferred_element_type=jnp.float32) + bkv[:, :hd]    # [S, hd]
            v = jnp.dot(xv_ref[0], wkv[:, hd:],
                        preferred_element_type=jnp.float32) + bkv[:, hd:]    # [S, hd]

        qm = q.astype(mxu_dtype)
        km = k.astype(mxu_dtype)
        vm = v.astype(mxu_dtype)
        mask_blk = mask_ref[0, 0]                        # [TQ, S]; upcasts on add to f32 scores

        # --- Per-head scores / softmax / context (static unroll over the head block) ---
        ctx_parts = []
        for hh in range(h_blk):
            sl = slice(hh * d, (hh + 1) * d)
            # scores[i,j] = sum_d q[i,d]*k[j,d]  — contract head dim of both (no K transpose).
            s = lax.dot_general(qm[:, sl], km[:, sl], (((1,), (1,)), ((), ())),
                                preferred_element_type=jnp.float32)          # [TQ, S]
            if has_pb:
                s = s + pb_ref[0, hh]                    # + position_bias  (PyTorch op order)
            if with_scale:
                s = s * scale                            # / sqrt(d)
            s = s + mask_blk                             # + mask
            m = jnp.max(s, axis=-1, keepdims=True)
            e = jnp.exp((s - m).astype(exp_dtype))
            l = jnp.sum(e.astype(jnp.float32), axis=-1, keepdims=True)
            p = (e * pl.reciprocal(l, approx=True)).astype(mxu_dtype)
            # TODO(synk): training-mode dropout on `p` would use pltpu.prng_seed/prng_random_bits.
            ctx_parts.append(jnp.dot(p, vm[:, sl],
                                     preferred_element_type=jnp.float32))    # [TQ, d]

        ctx = ctx_parts[0] if h_blk == 1 else jnp.concatenate(ctx_parts, axis=-1)  # [TQ, hd]
        partial_out = jnp.dot(ctx.astype(mxu_dtype), wo_ref[0],
                              preferred_element_type=jnp.float32)            # [TQ, H]

        # --- Accumulate over head blocks in an f32 VMEM scratch; single lane-dense writeback ---
        @pl.when(hb == 0)
        def _():
            acc_ref[...] = jnp.zeros_like(acc_ref)

        acc_ref[...] += partial_out

        @pl.when(hb == pl.num_programs(2) - 1)
        def _():
            out_ref[0] = (acc_ref[...] + bo_ref[...]).astype(out_ref.dtype)

    return kernel


# ----------------------------------------------------------------------------
# Wrapper
# ----------------------------------------------------------------------------
def multi_headed_attention(key, value, query, mask, params=None, position_bias=None, *,
                           heads_num, per_head_size, with_scale=True,
                           mxu_dtype=jnp.float32, head_block=None, q_block_size=None,
                           softmax_exp_dtype=jnp.float32, prepared_params=None):
    """Pallas forward pass equivalent to MultiHeadedAttention.forward (eval mode).

    key/value/query : [B, S, H] float32 (pass the SAME array for key/value to enable fused K/V)
    mask            : [B, 1, S, S] float32 (additive)
    position_bias   : [1, heads_num, S, S] or None
    mxu_dtype       : dtype for MXU operands and HBM/VMEM staging of activations/mask/pb
                      (bf16 recommended on all of v5e/v6e/v7x); accumulation/softmax stay f32.
    softmax_exp_dtype : dtype for the exp numerator (bf16 on v6e/v7x doubles EUP throughput).
    prepared_params : output of prepare_params() to skip per-call weight re-layout.
    Returns (output [B, S, H] float32, None)   # has_residual_attention=False path
    """
    B, S, H = query.shape
    h, d = heads_num, per_head_size
    inner = h * d

    if prepared_params is not None:
        prep = prepared_params
        h_blk = prep["head_block"]
        mxu_dtype = prep["mxu_dtype"]
    else:
        h_blk = head_block or _choose_head_block(h, d)
        prep = prepare_params(params, h, d, head_block=h_blk, mxu_dtype=mxu_dtype)
    assert h % h_blk == 0
    n_hb = h // h_blk
    hd = h_blk * d

    TQ = q_block_size or _choose_q_block(S)
    assert S % TQ == 0
    n_qt = S // TQ

    fuse_kv = key is value            # self-attention / shared KV: stream activation once, fuse K/V
    has_pb = position_bias is not None

    # Stage activations / mask / position-bias once in mxu_dtype (no per-step in-kernel casts).
    xq = query.astype(mxu_dtype)
    mask_c = mask.astype(mxu_dtype)
    pb_c = position_bias.astype(mxu_dtype) if has_pb else None

    operands = [xq]
    in_specs = [pl.BlockSpec((1, TQ, H), lambda b, qt, hb: (b, qt, 0))]
    if fuse_kv:
        operands.append(key.astype(mxu_dtype))
        in_specs.append(pl.BlockSpec((1, S, H), lambda b, qt, hb: (b, 0, 0)))
    else:
        operands += [key.astype(mxu_dtype), value.astype(mxu_dtype)]
        in_specs += [pl.BlockSpec((1, S, H), lambda b, qt, hb: (b, 0, 0)),
                     pl.BlockSpec((1, S, H), lambda b, qt, hb: (b, 0, 0))]
    operands.append(mask_c)
    in_specs.append(pl.BlockSpec((1, 1, TQ, S), lambda b, qt, hb: (b, 0, qt, 0)))
    if has_pb:
        operands.append(pb_c)
        in_specs.append(pl.BlockSpec((1, h_blk, TQ, S), lambda b, qt, hb: (0, hb, qt, 0)))
    operands += [prep["wq"], prep["bq"], prep["wkv"], prep["bkv"], prep["wo"], prep["bo"]]
    in_specs += [
        pl.BlockSpec((1, H, hd), lambda b, qt, hb: (hb, 0, 0)),        # Wq (head-block tile)
        pl.BlockSpec((1, 1, hd), lambda b, qt, hb: (hb, 0, 0)),        # bq
        pl.BlockSpec((1, H, 2 * hd), lambda b, qt, hb: (hb, 0, 0)),    # fused Wkv
        pl.BlockSpec((1, 1, 2 * hd), lambda b, qt, hb: (hb, 0, 0)),    # fused bkv
        pl.BlockSpec((1, hd, H), lambda b, qt, hb: (hb, 0, 0)),        # Wo (head-block tile)
        pl.BlockSpec((1, H), lambda b, qt, hb: (0, 0)),                # bo
    ]

    kernel = _make_mha_kernel(fuse_kv=fuse_kv, has_pb=has_pb, h_blk=h_blk, d=d,
                              with_scale=with_scale, mxu_dtype=mxu_dtype,
                              exp_dtype=softmax_exp_dtype)

    # Advisory cost estimate for XLA scheduling around the custom call.
    isz = jnp.dtype(mxu_dtype).itemsize
    flops = int(2 * B * S * H * inner                        # Q projection
                + 2 * 2 * B * n_qt * S * H * inner           # K/V projections (per q-tile)
                + 2 * 2 * B * h * S * S * d                  # QK^T and probs@V
                + 2 * B * S * inner * H)                     # output projection
    bytes_accessed = int(isz * ((1 if fuse_kv else 2) * B * n_qt * n_hb * S * H
                                + B * S * H
                                + B * n_hb * S * S
                                + (B * n_qt * h * S * S if has_pb else 0)
                                + B * n_qt * 4 * inner * H)
                         + 4 * B * S * H)
    cost = pl.CostEstimate(flops=flops, transcendentals=int(B * h * S * S),
                           bytes_accessed=bytes_accessed)

    out = pl.pallas_call(
        kernel,
        out_shape=jax.ShapeDtypeStruct((B, S, H), jnp.float32),
        grid_spec=pltpu.PrefetchScalarGridSpec(
            num_scalar_prefetch=0,
            grid=(B, n_qt, n_hb),
            in_specs=in_specs,
            out_specs=pl.BlockSpec((1, TQ, H), lambda b, qt, hb: (b, qt, 0)),
            scratch_shapes=[pltpu.VMEM((TQ, H), jnp.float32)],
        ),
        compiler_params=pltpu.CompilerParams(
            dimension_semantics=("parallel", "parallel", "arbitrary"),
            vmem_limit_bytes=_vmem_limit_bytes(S, H, TQ, hd, h_blk, fuse_kv, has_pb, mxu_dtype)),
        cost_estimate=cost,
    )(*operands)

    prev_attn_out = None  # has_residual_attention=False path
    return out, prev_attn_out


# ----------------------------------------------------------------------------
# Pure-JAX reference (mirrors the PyTorch forward, eval mode)
# ----------------------------------------------------------------------------
def _reference(key, value, query, mask, params, position_bias,
               heads_num, per_head_size, with_scale=True):
    B, S, H = query.shape
    wq, bq, wk, bk, wv, bv, wo, bo = params
    inner = heads_num * per_head_size

    def proj(x, w, b):
        y = x @ w.T + b
        return y.reshape(B, S, heads_num, per_head_size).transpose(0, 2, 1, 3)

    q = proj(query, wq, bq)
    k = proj(key, wk, bk)
    v = proj(value, wv, bv)
    scores = jnp.einsum('bhqd,bhkd->bhqk', q, k)
    if position_bias is not None:
        scores = scores + position_bias
    if with_scale:
        scores = scores / math.sqrt(float(per_head_size))
    scores = scores + mask
    probs = jax.nn.softmax(scores, axis=-1)
    ctx = jnp.einsum('bhqk,bhkd->bhqd', probs, v)
    ctx = ctx.transpose(0, 2, 1, 3).reshape(B, S, inner)
    return ctx @ wo.T + bo


if __name__ == "__main__":
    B, S, H = 2, 8, 32
    heads_num, per_head_size = 4, 8
    inner = heads_num * per_head_size

    root = jax.random.PRNGKey(0)
    keys = jax.random.split(root, 16)
    sc = 0.05

    wq = sc * jax.random.normal(keys[0], (inner, H), jnp.float32)
    bq = sc * jax.random.normal(keys[1], (inner,), jnp.float32)
    wk = sc * jax.random.normal(keys[2], (inner, H), jnp.float32)
    bk = sc * jax.random.normal(keys[3], (inner,), jnp.float32)
    wv = sc * jax.random.normal(keys[4], (inner, H), jnp.float32)
    bv = sc * jax.random.normal(keys[5], (inner,), jnp.float32)
    wo = sc * jax.random.normal(keys[6], (H, inner), jnp.float32)
    bo = sc * jax.random.normal(keys[7], (H,), jnp.float32)
    params = (wq, bq, wk, bk, wv, bv, wo, bo)

    query = jax.random.normal(keys[8], (B, S, H), jnp.float32)
    key_x = jax.random.normal(keys[9], (B, S, H), jnp.float32)
    value = jax.random.normal(keys[10], (B, S, H), jnp.float32)

    # additive mask: 0 where attended, -10000 where masked (BERT convention)
    mask_bits = (jax.random.uniform(keys[11], (B, 1, S, S)) > 0.1).astype(jnp.float32)
    mask = (1.0 - mask_bits) * -10000.0

    position_bias = 0.1 * jax.random.normal(keys[12], (1, heads_num, S, S), jnp.float32)

    # --- A: general (distinct q/k/v), with position_bias, f32 MXU path (strict) ---
    ref_a = _reference(key_x, value, query, mask, params, position_bias,
                       heads_num, per_head_size, with_scale=True)
    out_a, prev_attn = multi_headed_attention(
        key_x, value, query, mask, params, position_bias=position_bias,
        heads_num=heads_num, per_head_size=per_head_size, with_scale=True,
        mxu_dtype=jnp.float32)
    out_a = jax.block_until_ready(out_a)
    assert out_a.shape == (B, S, H)
    assert prev_attn is None
    assert jnp.max(jnp.abs(out_a - ref_a)) < 2e-3, "general f32 kernel mismatch vs reference"

    # --- B: self-attention (key is value is query), fused-KV path, pre-prepared params, f32 ---
    x = query
    ref_b = _reference(x, x, x, mask, params, position_bias,
                       heads_num, per_head_size, with_scale=True)
    prepared_f32 = prepare_params(params, heads_num, per_head_size,
                                  head_block=_choose_head_block(heads_num, per_head_size),
                                  mxu_dtype=jnp.float32)
    out_b, _ = multi_headed_attention(
        x, x, x, mask, None, position_bias=position_bias,
        heads_num=heads_num, per_head_size=per_head_size, with_scale=True,
        prepared_params=prepared_f32)
    out_b = jax.block_until_ready(out_b)
    assert jnp.max(jnp.abs(out_b - ref_b)) < 2e-3, "shared-KV f32 kernel mismatch vs reference"

    # --- C: self-attention, no position_bias, bf16 staging (throughput mode, all TPU gens) ---
    ref_c = _reference(x, x, x, mask, params, None,
                       heads_num, per_head_size, with_scale=True)
    out_c, _ = multi_headed_attention(
        x, x, x, mask, params, position_bias=None,
        heads_num=heads_num, per_head_size=per_head_size, with_scale=True,
        mxu_dtype=jnp.bfloat16)
    out_c = jax.block_until_ready(out_c)
    assert jnp.max(jnp.abs(out_c - ref_c)) < 5e-2, "bf16 kernel mismatch vs reference"

    print("KERNEL_OK")
</pallas_src>

<mosaic_0001>
module attributes {stable_mosaic.version = 11 : i64} {
  func.func @kernel(%arg0: i32, %arg1: i32, %arg2: i32, %arg3: memref<1x8x32xf32, #tpu.memory_space<vmem>>, %arg4: memref<1x8x32xf32, #tpu.memory_space<vmem>>, %arg5: memref<1x8x32xf32, #tpu.memory_space<vmem>>, %arg6: memref<1x1x8x8xf32, #tpu.memory_space<vmem>>, %arg7: memref<1x4x8x8xf32, #tpu.memory_space<vmem>>, %arg8: memref<1x32x32xf32, #tpu.memory_space<vmem>>, %arg9: memref<1x1x32xf32, #tpu.memory_space<vmem>>, %arg10: memref<1x32x64xf32, #tpu.memory_space<vmem>>, %arg11: memref<1x1x64xf32, #tpu.memory_space<vmem>>, %arg12: memref<1x32x32xf32, #tpu.memory_space<vmem>>, %arg13: memref<1x32xf32, #tpu.memory_space<vmem>>, %arg14: memref<1x8x32xf32, #tpu.memory_space<vmem>>, %arg15: memref<8x32xf32, #tpu.memory_space<vmem>>) attributes {dimension_semantics = [#tpu.dimension_semantics<parallel>, #tpu.dimension_semantics<parallel>, #tpu.dimension_semantics<arbitrary>], iteration_bounds = array<i64: 2, 1, 1>, scalar_prefetch = 0 : i64, scratch_operands = 1 : i64, tpu.core_type = #tpu.core_type<tc>, window_params = [{transform_indices = @transform_0, window_bounds = array<i64: 1, 8, 32>}, {transform_indices = @transform_1, window_bounds = array<i64: 1, 8, 32>}, {transform_indices = @transform_2, window_bounds = array<i64: 1, 8, 32>}, {transform_indices = @transform_3, window_bounds = array<i64: 1, 1, 8, 8>}, {transform_indices = @transform_4, window_bounds = array<i64: 1, 4, 8, 8>}, {transform_indices = @transform_5, window_bounds = array<i64: 1, 32, 32>}, {transform_indices = @transform_6, window_bounds = array<i64: 1, 1, 32>}, {transform_indices = @transform_7, window_bounds = array<i64: 1, 32, 64>}, {transform_indices = @transform_8, window_bounds = array<i64: 1, 1, 64>}, {transform_indices = @transform_9, window_bounds = array<i64: 1, 32, 32>}, {pipeline_mode = #tpu.pipeline_mode<synchronous>, transform_indices = @transform_10, window_bounds = array<i64: 1, 32>}, {transform_indices = @transform_11, window_bounds = array<i64: 1, 8, 32>}]} {
    %c0 = arith.constant 0 : index
    %c0_0 = arith.constant 0 : index
    %c0_1 = arith.constant 0 : index
    %0 = vector.load %arg3[%c0, %c0_0, %c0_1] : memref<1x8x32xf32, #tpu.memory_space<vmem>>, vector<1x8x32xf32>
    %1 = vector.shape_cast %0 : vector<1x8x32xf32> to vector<8x32xf32>
    %c0_2 = arith.constant 0 : index
    %c0_3 = arith.constant 0 : index
    %c0_4 = arith.constant 0 : index
    %2 = vector.load %arg8[%c0_2, %c0_3, %c0_4] : memref<1x32x32xf32, #tpu.memory_space<vmem>>, vector<1x32x32xf32>
    %3 = vector.shape_cast %2 : vector<1x32x32xf32> to vector<32x32xf32>
    %cst = arith.constant dense<0.000000e+00> : vector<8x32xf32>
    %4 = tpu.matmul %1, %3, %cst {dimension_numbers = #tpu.dot_dimension_numbers<[1], [0], [0], [1], [0, 0, 1, 1], [], []>} : vector<8x32xf32>, vector<32x32xf32>, vector<8x32xf32> -> vector<8x32xf32>
    %c0_5 = arith.constant 0 : index
    %c0_6 = arith.constant 0 : index
    %c0_7 = arith.constant 0 : index
    %5 = vector.load %arg9[%c0_5, %c0_6, %c0_7] : memref<1x1x32xf32, #tpu.memory_space<vmem>>, vector<1x1x32xf32>
    %6 = vector.shape_cast %5 : vector<1x1x32xf32> to vector<1x32xf32>
    %7 = vector.broadcast %6 : vector<1x32xf32> to vector<8x32xf32>
    %8 = arith.addf %4, %7 : vector<8x32xf32>
    %c0_8 = arith.constant 0 : index
    %c0_9 = arith.constant 0 : index
    %c0_10 = arith.constant 0 : index
    %9 = vector.load %arg10[%c0_8, %c0_9, %c0_10] : memref<1x32x64xf32, #tpu.memory_space<vmem>>, vector<1x32x64xf32>
    %10 = vector.shape_cast %9 : vector<1x32x64xf32> to vector<32x64xf32>
    %c0_11 = arith.constant 0 : index
    %c0_12 = arith.constant 0 : index
    %c0_13 = arith.constant 0 : index
    %11 = vector.load %arg11[%c0_11, %c0_12, %c0_13] : memref<1x1x64xf32, #tpu.memory_space<vmem>>, vector<1x1x64xf32>
    %12 = vector.shape_cast %11 : vector<1x1x64xf32> to vector<1x64xf32>
    %c0_14 = arith.constant 0 : index
    %c0_15 = arith.constant 0 : index
    %c0_16 = arith.constant 0 : index
    %13 = vector.load %arg4[%c0_14, %c0_15, %c0_16] : memref<1x8x32xf32, #tpu.memory_space<vmem>>, vector<1x8x32xf32>
    %14 = vector.shape_cast %13 : vector<1x8x32xf32> to vector<8x32xf32>
    %15 = vector.extract_strided_slice %10 {offsets = [0, 0], sizes = [32, 32], strides = [1, 1]} : vector<32x64xf32> to vector<32x32xf32>
    %cst_17 = arith.constant dense<0.000000e+00> : vector<8x32xf32>
    %16 = tpu.matmul %14, %15, %cst_17 {dimension_numbers = #tpu.dot_dimension_numbers<[1], [0], [0], [1], [0, 0, 1, 1], [], []>} : vector<8x32xf32>, vector<32x32xf32>, vector<8x32xf32> -> vector<8x32xf32>
    %17 = vector.extract_strided_slice %12 {offsets = [0, 0], sizes = [1, 32], strides = [1, 1]} : vector<1x64xf32> to vector<1x32xf32>
    %18 = vector.broadcast %17 : vector<1x32xf32> to vector<8x32xf32>
    %19 = arith.addf %16, %18 : vector<8x32xf32>
    %c0_18 = arith.constant 0 : index
    %c0_19 = arith.constant 0 : index
    %c0_20 = arith.constant 0 : index
    %20 = vector.load %arg5[%c0_18, %c0_19, %c0_20] : memref<1x8x32xf32, #tpu.memory_space<vmem>>, vector<1x8x32xf32>
    %21 = vector.shape_cast %20 : vector<1x8x32xf32> to vector<8x32xf32>
    %22 = vector.extract_strided_slice %10 {offsets = [0, 32], sizes = [32, 32], strides = [1, 1]} : vector<32x64xf32> to vector<32x32xf32>
    %cst_21 = arith.constant dense<0.000000e+00> : vector<8x32xf32>
    %23 = tpu.matmul %21, %22, %cst_21 {dimension_numbers = #tpu.dot_dimension_numbers<[1], [0], [0], [1], [0, 0, 1, 1], [], []>} : vector<8x32xf32>, vector<32x32xf32>, vector<8x32xf32> -> vector<8x32xf32>
    %24 = vector.extract_strided_slice %12 {offsets = [0, 32], sizes = [1, 32], strides = [1, 1]} : vector<1x64xf32> to vector<1x32xf32>
    %25 = vector.broadcast %24 : vector<1x32xf32> to vector<8x32xf32>
    %26 = arith.addf %23, %25 : vector<8x32xf32>
    %c0_22 = arith.constant 0 : index
    %c0_23 = arith.constant 0 : index
    %c0_24 = arith.constant 0 : index
    %c0_25 = arith.constant 0 : index
    %27 = vector.load %arg6[%c0_22, %c0_23, %c0_24, %c0_25] : memref<1x1x8x8xf32, #tpu.memory_space<vmem>>, vector<1x1x8x8xf32>
    %28 = vector.shape_cast %27 : vector<1x1x8x8xf32> to vector<8x8xf32>
    %29 = vector.extract_strided_slice %8 {offsets = [0, 0], sizes = [8, 8], strides = [1, 1]} : vector<8x32xf32> to vector<8x8xf32>
    %30 = vector.extract_strided_slice %19 {offsets = [0, 0], sizes = [8, 8], strides = [1, 1]} : vector<8x32xf32> to vector<8x8xf32>
    %cst_26 = arith.constant dense<0.000000e+00> : vector<8x8xf32>
    %31 = tpu.matmul %29, %30, %cst_26 {dimension_numbers = #tpu.dot_dimension_numbers<[1], [1], [0], [0], [0, 0, 1, 0], [], []>} : vector<8x8xf32>, vector<8x8xf32>, vector<8x8xf32> -> vector<8x8xf32>
    %c0_27 = arith.constant 0 : index
    %c0_28 = arith.constant 0 : index
    %c0_29 = arith.constant 0 : index
    %c0_30 = arith.constant 0 : index
    %32 = vector.load %arg7[%c0_27, %c0_28, %c0_29, %c0_30] : memref<1x4x8x8xf32, #tpu.memory_space<vmem>>, vector<1x1x8x8xf32>
    %33 = vector.shape_cast %32 : vector<1x1x8x8xf32> to vector<8x8xf32>
    %34 = arith.addf %31, %33 : vector<8x8xf32>
    %cst_31 = arith.constant 0.353553385 : f32
    %35 = vector.broadcast %cst_31 : f32 to vector<8x8xf32>
    %36 = arith.mulf %34, %35 : vector<8x8xf32>
    %37 = arith.addf %36, %28 : vector<8x8xf32>
    %cst_32 = arith.constant dense<0xFF800000> : vector<8xf32>
    %38 = vector.multi_reduction <maximumf>, %37, %cst_32 [1] : vector<8x8xf32> to vector<8xf32>
    %39 = vector.shape_cast %38 : vector<8xf32> to vector<8x1xf32>
    %40 = vector.broadcast %39 : vector<8x1xf32> to vector<8x8xf32>
    %41 = arith.subf %37, %40 : vector<8x8xf32>
    %42 = math.exp %41 : vector<8x8xf32>
    %cst_33 = arith.constant dense<0.000000e+00> : vector<8xf32>
    %43 = vector.multi_reduction <add>, %42, %cst_33 [1] : vector<8x8xf32> to vector<8xf32>
    %44 = vector.shape_cast %43 : vector<8xf32> to vector<8x1xf32>
    %45 = tpu.reciprocal %44 {approx = true} : vector<8x1xf32> -> vector<8x1xf32>
    %46 = vector.broadcast %45 : vector<8x1xf32> to vector<8x8xf32>
    %47 = arith.mulf %42, %46 : vector<8x8xf32>
    %48 = vector.extract_strided_slice %26 {offsets = [0, 0], sizes = [8, 8], strides = [1, 1]} : vector<8x32xf32> to vector<8x8xf32>
    %cst_34 = arith.constant dense<0.000000e+00> : vector<8x8xf32>
    %49 = tpu.matmul %47, %48, %cst_34 {dimension_numbers = #tpu.dot_dimension_numbers<[1], [0], [0], [1], [0, 0, 1, 1], [], []>} : vector<8x8xf32>, vector<8x8xf32>, vector<8x8xf32> -> vector<8x8xf32>
    %50 = vector.extract_strided_slice %8 {offsets = [0, 8], sizes = [8, 8], strides = [1, 1]} : vector<8x32xf32> to vector<8x8xf32>
    %51 = vector.extract_strided_slice %19 {offsets = [0, 8], sizes = [8, 8], strides = [1, 1]} : vector<8x32xf32> to vector<8x8xf32>
    %cst_35 = arith.constant dense<0.000000e+00> : vector<8x8xf32>
    %52 = tpu.matmul %50, %51, %cst_35 {dimension_numbers = #tpu.dot_dimension_numbers<[1], [1], [0], [0], [0, 0, 1, 0], [], []>} : vector<8x8xf32>, vector<8x8xf32>, vector<8x8xf32> -> vector<8x8xf32>
    %c0_36 = arith.constant 0 : index
    %c1 = arith.constant 1 : index
    %c0_37 = arith.constant 0 : index
    %c0_38 = arith.constant 0 : index
    %53 = vector.load %arg7[%c0_36, %c1, %c0_37, %c0_38] : memref<1x4x8x8xf32, #tpu.memory_space<vmem>>, vector<1x1x8x8xf32>
    %54 = vector.shape_cast %53 : vector<1x1x8x8xf32> to vector<8x8xf32>
    %55 = arith.addf %52, %54 : vector<8x8xf32>
    %cst_39 = arith.constant 0.353553385 : f32
    %56 = vector.broadcast %cst_39 : f32 to vector<8x8xf32>
    %57 = arith.mulf %55, %56 : vector<8x8xf32>
    %58 = arith.addf %57, %28 : vector<8x8xf32>
    %cst_40 = arith.constant dense<0xFF800000> : vector<8xf32>
    %59 = vector.multi_reduction <maximumf>, %58, %cst_40 [1] : vector<8x8xf32> to vector<8xf32>
    %60 = vector.shape_cast %59 : vector<8xf32> to vector<8x1xf32>
    %61 = vector.broadcast %60 : vector<8x1xf32> to vector<8x8xf32>
    %62 = arith.subf %58, %61 : vector<8x8xf32>
    %63 = math.exp %62 : vector<8x8xf32>
    %cst_41 = arith.constant dense<0.000000e+00> : vector<8xf32>
    %64 = vector.multi_reduction <add>, %63, %cst_41 [1] : vector<8x8xf32> to vector<8xf32>
    %65 = vector.shape_cast %64 : vector<8xf32> to vector<8x1xf32>
    %66 = tpu.reciprocal %65 {approx = true} : vector<8x1xf32> -> vector<8x1xf32>
    %67 = vector.broadcast %66 : vector<8x1xf32> to vector<8x8xf32>
    %68 = arith.mulf %63, %67 : vector<8x8xf32>
    %69 = vector.extract_strided_slice %26 {offsets = [0, 8], sizes = [8, 8], strides = [1, 1]} : vector<8x32xf32> to vector<8x8xf32>
    %cst_42 = arith.constant dense<0.000000e+00> : vector<8x8xf32>
    %70 = tpu.matmul %68, %69, %cst_42 {dimension_numbers = #tpu.dot_dimension_numbers<[1], [0], [0], [1], [0, 0, 1, 1], [], []>} : vector<8x8xf32>, vector<8x8xf32>, vector<8x8xf32> -> vector<8x8xf32>
    %71 = vector.extract_strided_slice %8 {offsets = [0, 16], sizes = [8, 8], strides = [1, 1]} : vector<8x32xf32> to vector<8x8xf32>
    %72 = vector.extract_strided_slice %19 {offsets = [0, 16], sizes = [8, 8], strides = [1, 1]} : vector<8x32xf32> to vector<8x8xf32>
    %cst_43 = arith.constant dense<0.000000e+00> : vector<8x8xf32>
    %73 = tpu.matmul %71, %72, %cst_43 {dimension_numbers = #tpu.dot_dimension_numbers<[1], [1], [0], [0], [0, 0, 1, 0], [], []>} : vector<8x8xf32>, vector<8x8xf32>, vector<8x8xf32> -> vector<8x8xf32>
    %c0_44 = arith.constant 0 : index
    %c2 = arith.constant 2 : index
    %c0_45 = arith.constant 0 : index
    %c0_46 = arith.constant 0 : index
    %74 = vector.load %arg7[%c0_44, %c2, %c0_45, %c0_46] : memref<1x4x8x8xf32, #tpu.memory_space<vmem>>, vector<1x1x8x8xf32>
    %75 = vector.shape_cast %74 : vector<1x1x8x8xf32> to vector<8x8xf32>
    %76 = arith.addf %73, %75 : vector<8x8xf32>
    %cst_47 = arith.constant 0.353553385 : f32
    %77 = vector.broadcast %cst_47 : f32 to vector<8x8xf32>
    %78 = arith.mulf %76, %77 : vector<8x8xf32>
    %79 = arith.addf %78, %28 : vector<8x8xf32>
    %cst_48 = arith.constant dense<0xFF800000> : vector<8xf32>
    %80 = vector.multi_reduction <maximumf>, %79, %cst_48 [1] : vector<8x8xf32> to vector<8xf32>
    %81 = vector.shape_cast %80 : vector<8xf32> to vector<8x1xf32>
    %82 = vector.broadcast %81 : vector<8x1xf32> to vector<8x8xf32>
    %83 = arith.subf %79, %82 : vector<8x8xf32>
    %84 = math.exp %83 : vector<8x8xf32>
    %cst_49 = arith.constant dense<0.000000e+00> : vector<8xf32>
    %85 = vector.multi_reduction <add>, %84, %cst_49 [1] : vector<8x8xf32> to vector<8xf32>
    %86 = vector.shape_cast %85 : vector<8xf32> to vector<8x1xf32>
    %87 = tpu.reciprocal %86 {approx = true} : vector<8x1xf32> -> vector<8x1xf32>
    %88 = vector.broadcast %87 : vector<8x1xf32> to vector<8x8xf32>
    %89 = arith.mulf %84, %88 : vector<8x8xf32>
    %90 = vector.extract_strided_slice %26 {offsets = [0, 16], sizes = [8, 8], strides = [1, 1]} : vector<8x32xf32> to vector<8x8xf32>
    %cst_50 = arith.constant dense<0.000000e+00> : vector<8x8xf32>
    %91 = tpu.matmul %89, %90, %cst_50 {dimension_numbers = #tpu.dot_dimension_numbers<[1], [0], [0], [1], [0, 0, 1, 1], [], []>} : vector<8x8xf32>, vector<8x8xf32>, vector<8x8xf32> -> vector<8x8xf32>
    %92 = vector.extract_strided_slice %8 {offsets = [0, 24], sizes = [8, 8], strides = [1, 1]} : vector<8x32xf32> to vector<8x8xf32>
    %93 = vector.extract_strided_slice %19 {offsets = [0, 24], sizes = [8, 8], strides = [1, 1]} : vector<8x32xf32> to vector<8x8xf32>
    %cst_51 = arith.constant dense<0.000000e+00> : vector<8x8xf32>
    %94 = tpu.matmul %92, %93, %cst_51 {dimension_numbers = #tpu.dot_dimension_numbers<[1], [1], [0], [0], [0, 0, 1, 0], [], []>} : vector<8x8xf32>, vector<8x8xf32>, vector<8x8xf32> -> vector<8x8xf32>
    %c0_52 = arith.constant 0 : index
    %c3 = arith.constant 3 : index
    %c0_53 = arith.constant 0 : index
    %c0_54 = arith.constant 0 : index
    %95 = vector.load %arg7[%c0_52, %c3, %c0_53, %c0_54] : memref<1x4x8x8xf32, #tpu.memory_space<vmem>>, vector<1x1x8x8xf32>
    %96 = vector.shape_cast %95 : vector<1x1x8x8xf32> to vector<8x8xf32>
    %97 = arith.addf %94, %96 : vector<8x8xf32>
    %cst_55 = arith.constant 0.353553385 : f32
    %98 = vector.broadcast %cst_55 : f32 to vector<8x8xf32>
    %99 = arith.mulf %97, %98 : vector<8x8xf32>
    %100 = arith.addf %99, %28 : vector<8x8xf32>
    %cst_56 = arith.constant dense<0xFF800000> : vector<8xf32>
    %101 = vector.multi_reduction <maximumf>, %100, %cst_56 [1] : vector<8x8xf32> to vector<8xf32>
    %102 = vector.shape_cast %101 : vector<8xf32> to vector<8x1xf32>
    %103 = vector.broadcast %102 : vector<8x1xf32> to vector<8x8xf32>
    %104 = arith.subf %100, %103 : vector<8x8xf32>
    %105 = math.exp %104 : vector<8x8xf32>
    %cst_57 = arith.constant dense<0.000000e+00> : vector<8xf32>
    %106 = vector.multi_reduction <add>, %105, %cst_57 [1] : vector<8x8xf32> to vector<8xf32>
    %107 = vector.shape_cast %106 : vector<8xf32> to vector<8x1xf32>
    %108 = tpu.reciprocal %107 {approx = true} : vector<8x1xf32> -> vector<8x1xf32>
    %109 = vector.broadcast %108 : vector<8x1xf32> to vector<8x8xf32>
    %110 = arith.mulf %105, %109 : vector<8x8xf32>
    %111 = vector.extract_strided_slice %26 {offsets = [0, 24], sizes = [8, 8], strides = [1, 1]} : vector<8x32xf32> to vector<8x8xf32>
    %cst_58 = arith.constant dense<0.000000e+00> : vector<8x8xf32>
    %112 = tpu.matmul %110, %111, %cst_58 {dimension_numbers = #tpu.dot_dimension_numbers<[1], [0], [0], [1], [0, 0, 1, 1], [], []>} : vector<8x8xf32>, vector<8x8xf32>, vector<8x8xf32> -> vector<8x8xf32>
    %113 = tpu.concatenate %49, %70, %91, %112 in 1 : vector<8x8xf32>, vector<8x8xf32>, vector<8x8xf32>, vector<8x8xf32> -> vector<8x32xf32>
    %c0_59 = arith.constant 0 : index
    %c0_60 = arith.constant 0 : index
    %c0_61 = arith.constant 0 : index
    %114 = vector.load %arg12[%c0_59, %c0_60, %c0_61] : memref<1x32x32xf32, #tpu.memory_space<vmem>>, vector<1x32x32xf32>
    %115 = vector.shape_cast %114 : vector<1x32x32xf32> to vector<32x32xf32>
    %cst_62 = arith.constant dense<0.000000e+00> : vector<8x32xf32>
    %116 = tpu.matmul %113, %115, %cst_62 {dimension_numbers = #tpu.dot_dimension_numbers<[1], [0], [0], [1], [0, 0, 1, 1], [], []>} : vector<8x32xf32>, vector<32x32xf32>, vector<8x32xf32> -> vector<8x32xf32>
    %c0_i32 = arith.constant 0 : i32
    %117 = arith.cmpi eq, %arg2, %c0_i32 : i32
    %118 = arith.extui %117 : i1 to i32
    %c0_i32_63 = arith.constant 0 : i32
    %119 = arith.cmpi ne, %118, %c0_i32_63 : i32
    scf.if %119 {
      %cst_70 = arith.constant 0.000000e+00 : f32
      %126 = vector.broadcast %cst_70 : f32 to vector<8x32xf32>
      %c0_71 = arith.constant 0 : index
      %c0_72 = arith.constant 0 : index
      %127 = vector.load %arg15[%c0_71, %c0_72] : memref<8x32xf32, #tpu.memory_space<vmem>>, vector<8x32xf32>
      tpu.vector_store %arg15[%c0_71, %c0_72], %126 {strides = array<i32>} : memref<8x32xf32, #tpu.memory_space<vmem>>, vector<8x32xf32>,
    } else {
    }
    %c0_64 = arith.constant 0 : index
    %c0_65 = arith.constant 0 : index
    %120 = vector.load %arg15[%c0_64, %c0_65] : memref<8x32xf32, #tpu.memory_space<vmem>>, vector<8x32xf32>
    %121 = arith.addf %120, %116 : vector<8x32xf32>
    %c0_66 = arith.constant 0 : index
    %c0_67 = arith.constant 0 : index
    %122 = vector.load %arg15[%c0_66, %c0_67] : memref<8x32xf32, #tpu.memory_space<vmem>>, vector<8x32xf32>
    tpu.vector_store %arg15[%c0_66, %c0_67], %121 {strides = array<i32>} : memref<8x32xf32, #tpu.memory_space<vmem>>, vector<8x32xf32>,
    %c0_i32_68 = arith.constant 0 : i32
    %123 = arith.cmpi eq, %arg2, %c0_i32_68 : i32
    %124 = arith.extui %123 : i1 to i32
    %c0_i32_69 = arith.constant 0 : i32
    %125 = arith.cmpi ne, %124, %c0_i32_69 : i32
    scf.if %125 {
      %c0_70 = arith.constant 0 : index
      %c0_71 = arith.constant 0 : index
      %126 = vector.load %arg15[%c0_70, %c0_71] : memref<8x32xf32, #tpu.memory_space<vmem>>, vector<8x32xf32>
      %c0_72 = arith.constant 0 : index
      %c0_73 = arith.constant 0 : index
      %127 = vector.load %arg13[%c0_72, %c0_73] : memref<1x32xf32, #tpu.memory_space<vmem>>, vector<1x32xf32>
      %128 = vector.broadcast %127 : vector<1x32xf32> to vector<8x32xf32>
      %129 = arith.addf %126, %128 : vector<8x32xf32>
      %c0_74 = arith.constant 0 : index
      %c0_75 = arith.constant 0 : index
      %c0_76 = arith.constant 0 : index
      %130 = vector.load %arg14[%c0_74, %c0_75, %c0_76] : memref<1x8x32xf32, #tpu.memory_space<vmem>>, vector<1x8x32xf32>
      %131 = vector.shape_cast %130 : vector<1x8x32xf32> to vector<8x32xf32>
      %132 = vector.shape_cast %129 : vector<8x32xf32> to vector<1x8x32xf32>
      tpu.vector_store %arg14[%c0_74, %c0_75, %c0_76], %132 {strides = array<i32>} : memref<1x8x32xf32, #tpu.memory_space<vmem>>, vector<1x8x32xf32>,
    } else {
    }
    return
  }
  func.func @transform_0(%arg0: i32, %arg1: i32, %arg2: i32) -> (i32, i32, i32) {
    %c0_i32 = arith.constant 0 : i32
    %c0_i32_0 = arith.constant 0 : i32
    return %arg0, %arg1, %c0_i32 : i32, i32, i32
  }
  func.func @transform_1(%arg0: i32, %arg1: i32, %arg2: i32) -> (i32, i32, i32) {
    %c0_i32 = arith.constant 0 : i32
    %c0_i32_0 = arith.constant 0 : i32
    %c0_i32_1 = arith.constant 0 : i32
    return %arg0, %c0_i32, %c0_i32_0 : i32, i32, i32
  }
  func.func @transform_2(%arg0: i32, %arg1: i32, %arg2: i32) -> (i32, i32, i32) {
    %c0_i32 = arith.constant 0 : i32
    %c0_i32_0 = arith.constant 0 : i32
    %c0_i32_1 = arith.constant 0 : i32
    return %arg0, %c0_i32, %c0_i32_0 : i32, i32, i32
  }
  func.func @transform_3(%arg0: i32, %arg1: i32, %arg2: i32) -> (i32, i32, i32, i32) {
    %c0_i32 = arith.constant 0 : i32
    %c0_i32_0 = arith.constant 0 : i32
    %c0_i32_1 = arith.constant 0 : i32
    return %arg0, %c0_i32, %arg1, %c0_i32_0 : i32, i32, i32, i32
  }
  func.func @transform_4(%arg0: i32, %arg1: i32, %arg2: i32) -> (i32, i32, i32, i32) {
    %c0_i32 = arith.constant 0 : i32
    %c0_i32_0 = arith.constant 0 : i32
    %c0_i32_1 = arith.constant 0 : i32
    return %c0_i32, %arg2, %arg1, %c0_i32_0 : i32, i32, i32, i32
  }
  func.func @transform_5(%arg0: i32, %arg1: i32, %arg2: i32) -> (i32, i32, i32) {
    %c0_i32 = arith.constant 0 : i32
    %c0_i32_0 = arith.constant 0 : i32
    %c0_i32_1 = arith.constant 0 : i32
    return %arg2, %c0_i32, %c0_i32_0 : i32, i32, i32
  }
  func.func @transform_6(%arg0: i32, %arg1: i32, %arg2: i32) -> (i32, i32, i32) {
    %c0_i32 = arith.constant 0 : i32
    %c0_i32_0 = arith.constant 0 : i32
    %c0_i32_1 = arith.constant 0 : i32
    return %arg2, %c0_i32, %c0_i32_0 : i32, i32, i32
  }
  func.func @transform_7(%arg0: i32, %arg1: i32, %arg2: i32) -> (i32, i32, i32) {
    %c0_i32 = arith.constant 0 : i32
    %c0_i32_0 = arith.constant 0 : i32
    %c0_i32_1 = arith.constant 0 : i32
    return %arg2, %c0_i32, %c0_i32_0 : i32, i32, i32
  }
  func.func @transform_8(%arg0: i32, %arg1: i32, %arg2: i32) -> (i32, i32, i32) {
    %c0_i32 = arith.constant 0 : i32
    %c0_i32_0 = arith.constant 0 : i32
    %c0_i32_1 = arith.constant 0 : i32
    return %arg2, %c0_i32, %c0_i32_0 : i32, i32, i32
  }
  func.func @transform_9(%arg0: i32, %arg1: i32, %arg2: i32) -> (i32, i32, i32) {
    %c0_i32 = arith.constant 0 : i32
    %c0_i32_0 = arith.constant 0 : i32
    %c0_i32_1 = arith.constant 0 : i32
    return %arg2, %c0_i32, %c0_i32_0 : i32, i32, i32
  }
  func.func @transform_10(%arg0: i32, %arg1: i32, %arg2: i32) -> (i32, i32) {
    %c0_i32 = arith.constant 0 : i32
    %c0_i32_0 = arith.constant 0 : i32
    %c0_i32_1 = arith.constant 0 : i32
    return %c0_i32, %c0_i32_0 : i32, i32
  }
  func.func @transform_11(%arg0: i32, %arg1: i32, %arg2: i32) -> (i32, i32, i32) {
    %c0_i32 = arith.constant 0 : i32
    %c0_i32_0 = arith.constant 0 : i32
    return %arg0, %arg1, %c0_i32 : i32, i32, i32
  }
}

</mosaic_0001>

<bundles_post_ra>
// kernel: tpu_custom_call.1
= control target key start
LH: loop header
LB: loop body
LE: loop exit
PB: predicated region body
PF: predicated region fallthrough
CT: control target
= control target key end

     0   :  { %s3184_s0 = inlined_call_operand.hbm [shape: f32[2,8,32], index: 0, kind: input, shape index: {}]   ;;  %s3185_s1 = inlined_call_operand.hbm [shape: f32[2,8,32], index: 1, kind: input, shape index: {}]   ;;  %s3186_s2 = inlined_call_operand.hbm [shape: f32[2,8,32], index: 2, kind: input, shape index: {}]   ;;  %s3187_s3 = inlined_call_operand.hbm [shape: f32[2,1,8,8], index: 3, kind: input, shape index: {}]   ;;  %s3188_s4 = inlined_call_operand.hbm [shape: f32[1,4,8,8], index: 4, kind: input, shape index: {}]   ;;  %s3189_s5 = inlined_call_operand.hbm [shape: f32[1,32,32], index: 5, kind: input, shape index: {}]   ;;  %s3190_s6 = inlined_call_operand.vmem [shape: f32[1,1,32], index: 6, kind: input, shape index: {}]   ;;  %s3191_s7 = inlined_call_operand.hbm [shape: f32[1,32,64], index: 7, kind: input, shape index: {}]   ;;  %s3192_s8 = inlined_call_operand.vmem [shape: f32[1,1,64], index: 8, kind: input, shape index: {}]   ;;  %s3193_s9 = inlined_call_operand.vmem [shape: f32[1,32,32], index: 9, kind: input, shape index: {}]   ;;  %s3194_s10 = inlined_call_operand.vmem [shape: f32[1,32], index: 10, kind: input, shape index: {}]   ;;  %s3195_s11 = inlined_call_operand.hbm [shape: f32[2,8,32], index: 11, kind: output, shape index: {}]  }
   0x1   :  { %3217 = sst [smem:[#allocation29_spill]] %s3184_s0 }
   0x2   :  { %3218 = sst [smem:[#allocation30_spill]] %s3185_s1 }
   0x3   :  { %3219 = sst [smem:[#allocation31_spill]] %s3188_s4 }
   0x4   :  { %3220 = sst [smem:[#allocation32_spill]] %s3189_s5 }
   0x5   :  { %3221 = sst [smem:[#allocation33_spill]] %s3193_s9 }
   0x6   :  { %3222 = sst [smem:[#allocation34_spill]] %s3194_s10 }
   0x7   :  { %3223 = sst [smem:[#allocation35_spill]] %s3195_s11 }
   0x8   :  { %16 = vsyncpa [#allocation4], 0 }
   0x9   :  { %18 = vsyncpa [#allocation4 + $0x1], 0 }
   0xa   :  { %19 = vsyncpa [#allocation7], 0 }
   0xb   :  { %21 = vsyncpa [#allocation7 + $0x1], 0 }
   0xc   :  { %22 = vsyncpa [#allocation10], 0 }
   0xd   :  { %24 = vsyncpa [#allocation10 + $0x1], 0 }
   0xe   :  { %25 = vsyncpa [#allocation13], 0 }
   0xf   :  { %26 = vsyncpa [#allocation5], 0 }
  0x10   :  { %28 = vsyncpa [#allocation5 + $0x1], 0  ;;  %s2672_s17 = smov 0   ;;  %s2674_s18 = smov 0  }
  0x11   :  { %s2676_s19 = smov 0   ;;  %s2678_s20 = smov 0  }
  0x12   :  { %s2680_s21 = smov 0   ;;  %s2682_s22 = smov 0  }
  0x13 LB: > { %3224 = sst [smem:[#allocation22_spill]] %s2570_s17  ;;  %s2703_s23 = sadd.s32 4294967295, %s2590_s22   ;;  %s2590_s22 = sphi %s2682_s22, %s34_s22   ;;  %s2586_s21 = sphi %s2680_s21, %s3271_s21   ;;  %s2582_s20 = sphi %s2678_s20, %s3270_s20   ;;  %s2578_s19 = sphi %s2676_s19, %s3274_s19   ;;  %s2574_s18 = sphi %s2674_s18, %s3273_s18   ;;  %s2570_s17 = sphi %s2672_s17, %s3272_s17  }
  0x14   : > { %3225 = sst [smem:[#allocation23_spill]] %s2582_s20  ;;  %s1949_s24 = sadd.s32 4294967294, %s2590_s22  }
  0x15   : > { %3226 = sst [smem:[#allocation24_spill]] %s2586_s21  ;;  %p75_p0 = scmp.ne.s32.totalorder %s2574_s18, %s2570_s17 }
  0x16   : > { %p3198_p1 = scmp.eq.s32.totalorder %s2703_s23, 0  ;;  %p366_p3 = scmp.eq.s32.totalorder %s1949_s24, 1 }
  0x17   : > { %p1950_p5 = scmp.ge.s32.totalorder %s2590_s22, 1  ;;  %p373_p7 = scmp.lt.s32.totalorder %s2590_s22, 3 }
  0x18   : > { %p2712_p4 = por %p3198_p1, %p75_p0  ;;  %p2717_p6 = por %p366_p3, %p75_p0 }
  0x19   : > { %p2722_p8 = pnand %p1950_p5, %p373_p7  ;;  %s2592_s28 = smov [#allocation11]  }
  0x1a   : > { %s3227_s25 = scalar_select %p2712_p4, 1, 0 }
  0x1b   : > { %s3228_s26 = scalar_select %p2717_p6, 1, 0 }
  0x1c   : > { %s3230_s27 = scalar_select %p2722_p8, 1, 0 }
  0x1d   : > { %3229 = sst [smem:[#allocation25_spill]] %s3228_s26  ;;  %s389_s29 = sshll.u32 %s2592_s28, 4  ;;  %s2726_s29 = int_to_ptr.vmem [resolvable:$true] %s389_s29 }
  0x1e   : > { %p2164_p9 = pneg %p2722_p8  ;;  %s2593_s12 = smov [#allocation12]  }
  0x1f   : > { %s405_s13 = sshll.u32 %s2593_s12, 4  ;;  %s3232_s4 = sld [smem:[#allocation31_spill]]  ;;  %s2737_s13 = int_to_ptr.vmem [resolvable:$true] %s405_s13 }
  0x20   : > { %p2733_p11 = pnand %p2164_p9, %p3198_p1 }
  0x22   : > { %s3231_s30 = scalar_select %p2733_p11, 1, 0 }
  0x23   : > { %p2747_p13 = pneg %p2733_p11 }
  0x25   : > { %s2288_s16 = scalar_lea.hbm %s3232_s4, 512 }
  0x26   : > { %p2289_p12 = scmp.ne.s32.totalorder %s3232_s4, %s2288_s16  ;;  %p2295_p5 = scmp.lt.u32.totalorder %s2288_s16, %s3232_s4 }
  0x27   : > { %s3233_s26 = scalar_select %p2747_p13, 1, 0 }
  0x28   : > { %p2291_p0 = pnand %p2747_p13, %p2289_p12 }
  0x2a   : > { %p2292_p3 = pneg %p2291_p0 }
  0x2c   : > { %p2297_p7 = pnand %p2295_p5, %p2292_p3 }
  0x2e   : > { %2300 = shalt.err (!%p2297_p7)
}
  0x2f   : > { %s2301_s14 = scalar_lea.vmem %s2726_s29, 512  ;;  %p2309_p2 = scmp.lt.s32.totalorder %s2726_s29, %s2726_s29 }
  0x30   : > { %p2302_p9 = scmp.ne.s32.totalorder %s2726_s29, %s2301_s14  ;;  %p2310_p6 = scmp.lt.s32.totalorder %s2301_s14, %s2301_s14 }
  0x32   : > { %p2304_p10 = pnand %p2302_p9, %p2747_p13  ;;  %p2311_p12 = por %p2310_p6, %p2309_p2 }
  0x34   : > { %p2305_p1 = pneg %p2304_p10 }
  0x36   : > { %p2312_p0 = pnand %p2311_p12, %p2305_p1 }
  0x38   : > { %2315 = shalt.err (!%p2312_p0)
}
  0x39   : > { %s3201_s15 = smov 128   ;;  %s3202_s17 = smov 8  }
  0x3a   : > { %2167 = dma.hbm_to_vmem [thread:$0]  (!%p2733_p11), %s3232_s4, 512, %s2726_s29, [#allocation10], %s3201_s15, %s3201_s15, %s3202_s17  }
  0x3b   : > { %s3234_s5 = sld [smem:[#allocation32_spill]] }
  0x41   : > { %s2316_s14 = scalar_lea.hbm %s3234_s5, 512 }
  0x42   : > { %p2317_p1 = scmp.ne.s32.totalorder %s3234_s5, %s2316_s14  ;;  %p2323_p10 = scmp.lt.u32.totalorder %s2316_s14, %s3234_s5 }
  0x44   : > { %p2319_p2 = pnand %p2317_p1, %p2747_p13 }
  0x46   : > { %p2320_p6 = pneg %p2319_p2 }
  0x48   : > { %p2325_p3 = pnand %p2323_p10, %p2320_p6 }
  0x4a   : > { %2328 = shalt.err (!%p2325_p3)
}
  0x4b   : > { %s2329_s29 = scalar_lea.vmem %s2737_s13, 512  ;;  %p2337_p12 = scmp.lt.s32.totalorder %s2737_s13, %s2737_s13 }
  0x4c   : > { %p2330_p5 = scmp.ne.s32.totalorder %s2737_s13, %s2329_s29  ;;  %p2338_p0 = scmp.lt.s32.totalorder %s2329_s29, %s2329_s29 }
  0x4e   : > { %p2332_p7 = pnand %p2330_p5, %p2747_p13  ;;  %p2339_p1 = por %p2338_p0, %p2337_p12 }
  0x50   : > { %p2333_p9 = pneg %p2332_p7 }
  0x52   : > { %p2340_p2 = pnand %p2339_p1, %p2333_p9 }
  0x54   : > { %2343 = shalt.err (!%p2340_p2)
}
  0x55   : > { %2170 = dma.hbm_to_vmem [thread:$0]  (!%p2733_p11), %s3234_s5, 512, %s2737_s13, [#allocation13], %s3201_s15, %s3201_s15, %s3202_s17  }
  0x56   : > { %s53_s11 = sadd.s32 1, %s2586_s21  ;;  %s62_s20 = sadd.s32 1, %s2578_s19 }
  0x57   : > { %p55_p6 = scmp.ge.s32.totalorder %s53_s11, 2  ;;  %p69_p10 = scmp.ne.s32.totalorder %s2578_s19, %s2574_s18 }
  0x58   : > { %p70_p3 = scmp.eq.s32.totalorder %s2590_s22, 0  ;;  %p2194_p5 = scmp.lt.s32.totalorder %s2590_s22, 2 }
  0x59   : > { %s3276_s11 = smov (%p55_p6, %s53_s11), 0  ;;  %p3236_p9 = scmp.eq.s32.totalorder %s2703_s23, 1 }
  0x5a   : > { %3235 = sst [smem:[#allocation26_spill]] %s3276_s11  ;;  %p71_p7 = por %p70_p3, %p69_p10 }
  0x5b   : > { %p2807_p12 = por %p3236_p9, %p69_p10  ;;  %s57_s24 = ssub.s32 %s2586_s21, %s3276_s11 }
  0x5c   : > { %s3203_s13 = sand.u32 1, %s2578_s19   ;;  %p60_p0 = scmp.eq.s32.totalorder %s57_s24, 0 }
  0x5d   : > { %s3237_s16 = scalar_select %p2807_p12, 1, 0 }
  0x5e   : > { %s2816_s28 = sshll.u32 %s3203_s13, 3  ;;  %s2819_s12 = sshll.u32 %s2586_s21, 7 }
  0x5f   : > { %3238 = sst [smem:[#allocation27_spill]] %s3237_s16  ;;  %p2821_p1 = pnand %p2194_p5, %p71_p7 }
  0x60   : > { %s2826_s29 = scalar_select %p60_p0, %s2578_s19, %s62_s20  }
  0x61   : > { %s3239_s14 = scalar_select %p2821_p1, 1, 0 }
  0x62   : > { %3240 = sst [smem:[#allocation28_spill]] %s2826_s29  ;;  %s3208_s9 = sand.u32 1, %s2590_s22  }
  0x63   : > { %s3241_s1 = sld [smem:[#allocation30_spill]]  ;;  %s481_s24 = scalar_lea.vmem [#allocation6], %s2816_s28 }
  0x64   : > { %s488_s13 = sshll.u32 %s481_s24, 4  ;;  %s2840_s4 = scalar_lea.sflag [#allocation7], %s3208_s9  ;;  %s2836_s13 = int_to_ptr.vmem [resolvable:$true] %s488_s13 }
  0x65   : > { %p2846_p6 = pneg %p2821_p1 }
  0x69   : > { %s2833_s17 = scalar_lea.hbm %s3241_s1, %s2819_s12  ;;  %s2349_s24 = scalar_lea.hbm %s3241_s1, 256 }
  0x6a   : > { %s2344_s5 = scalar_lea.hbm %s2833_s17, 128  ;;  %p2350_p5 = scmp.lt.u32.totalorder %s2833_s17, %s3241_s1 }
  0x6b   : > { %p2345_p2 = scmp.ne.s32.totalorder %s2833_s17, %s2344_s5  ;;  %p2351_p7 = scmp.lt.u32.totalorder %s2349_s24, %s2344_s5 }
  0x6c   : > { %p2353_p0 = scmp.lt.u32.totalorder %s2344_s5, %s2833_s17 }
  0x6d   : > { %p2347_p10 = pnand %p2846_p6, %p2345_p2  ;;  %p2352_p9 = por %p2351_p7, %p2350_p5 }
  0x6f   : > { %p2348_p3 = pneg %p2347_p10  ;;  %p2354_p12 = por %p2353_p0, %p2352_p9 }
  0x71   : > { %p2355_p4 = pnand %p2354_p12, %p2348_p3 }
  0x73   : > { %2358 = shalt.err (!%p2355_p4)
}
  0x74   : > { %s2359_s9 = scalar_lea.vmem %s2836_s13, 128  ;;  %s2596_s15 = smov [#allocation6]  }
  0x75   : > { %p2360_p2 = scmp.ne.s32.totalorder %s2836_s13, %s2359_s9  ;;  %s2364_s10 = sshll.u32 %s2596_s15, 4  ;;  %s2365_s10 = int_to_ptr.vmem [resolvable:$false] %s2364_s10 }
  0x76   : > { %s2366_s21 = scalar_lea.vmem %s2365_s10, 256  ;;  %p2367_p11 = scmp.lt.s32.totalorder %s2836_s13, %s2365_s10 }
  0x77   : > { %p2362_p10 = pnand %p2360_p2, %p2846_p6  ;;  %p2368_p13 = scmp.lt.s32.totalorder %s2366_s21, %s2359_s9 }
  0x79   : > { %p2363_p8 = pneg %p2362_p10  ;;  %p2369_p5 = por %p2368_p13, %p2367_p11 }
  0x7b   : > { %p2370_p7 = pnand %p2369_p5, %p2363_p8 }
  0x7d   : > { %2373 = shalt.err (!%p2370_p7)
}
  0x7e   : > { %2180 = dma.hbm_to_vmem [thread:$0]  (!%p2821_p1), %s2833_s17, 128, %s2836_s13, %s2840_s4  }
  0x7f   : > { %s2597_s5 = smov [#allocation14]   ;;  %s3243_s0 = sld [smem:[#allocation29_spill]] }
  0x80   : > { %s427_s11 = sshll.u32 %s2597_s5, 4  ;;  %s2374_s21 = scalar_lea.hbm %s3191_s7, 512  ;;  %s428_s11 = int_to_ptr.vmem [resolvable:$true] %s427_s11 }
  0x81   : > { %p2375_p4 = scmp.ne.s32.totalorder %s3191_s7, %s2374_s21  ;;  %p3244_p8 = scmp.ne.s32.totalorder %s3233_s26, 0 }
  0x82   : > { %p2381_p12 = scmp.lt.u32.totalorder %s2374_s21, %s3191_s7 }
  0x83   : > { %p2377_p11 = pnand %p2375_p4, %p3244_p8 }
  0x85   : > { %s2874_s1 = scalar_lea.hbm %s3243_s0, %s2819_s12  ;;  %p2378_p13 = pneg %p2377_p11 }
  0x87   : > { %p2383_p3 = pnand %p2381_p12, %p2378_p13 }
  0x89   : > { %2386 = shalt.err (!%p2383_p3)
}
  0x8a   : > { %s2387_s5 = scalar_lea.vmem %s428_s11, 512  ;;  %p2395_p10 = scmp.lt.s32.totalorder %s428_s11, %s428_s11 }
  0x8b   : > { %p2388_p9 = scmp.ne.s32.totalorder %s428_s11, %s2387_s5  ;;  %p2396_p5 = scmp.lt.s32.totalorder %s2387_s5, %s2387_s5 }
  0x8d   : > { %p2390_p0 = pnand %p2388_p9, %p3244_p8  ;;  %p2397_p7 = por %p2396_p5, %p2395_p10 }
  0x8f   : > { %p2391_p2 = pneg %p2390_p0 }
  0x91   : > { %p2398_p1 = pnand %p2397_p7, %p2391_p2 }
  0x93   : > { %2401 = shalt.err (!%p2398_p1)
}
  0x94   : > { %p3245_p4 = scmp.ne.s32.totalorder %s3231_s30, 0  ;;  %s3246_s16 = smov 8  }
  0x95   : > { %s3247_s29 = smov 128   ;;  %s462_s26 = scalar_lea.vmem [#allocation3], %s2816_s28 }
  0x96   : > { %2173 = dma.hbm_to_vmem [thread:$0]  (!%p3245_p4), %s3191_s7, 512, %s428_s11, [#allocation13], %s3247_s29, %s3247_s29, %s3246_s16  }
  0x97   : > { %s470_s9 = sshll.u32 %s462_s26, 4  ;;  %s2904_s21 = scalar_lea.hbm %s3186_s2, %s2819_s12  ;;  %s2898_s9 = int_to_ptr.vmem [resolvable:$true] %s470_s9 }
  0x98   : > { %s3248_s17 = sand.u32 1, %s2578_s19   ;;  %s2402_s5 = scalar_lea.hbm %s2874_s1, 128 }
  0x99   : > { %s459_s13 = scalar_lea.sflag [#allocation4], %s3248_s17  ;;  %p2403_p1 = scmp.ne.s32.totalorder %s2874_s1, %s2402_s5 }
  0x9a   : > { %s2407_s11 = scalar_lea.hbm %s3243_s0, 256  ;;  %p2408_p13 = scmp.lt.u32.totalorder %s2874_s1, %s3243_s0 }
  0x9b   : > { %p2405_p8 = pnand %p2403_p1, %p2846_p6  ;;  %p2409_p12 = scmp.lt.u32.totalorder %s2407_s11, %s2402_s5 }
  0x9c   : > { %p2411_p9 = scmp.lt.u32.totalorder %s2402_s5, %s2874_s1 }
  0x9d   : > { %p2406_p11 = pneg %p2405_p8  ;;  %p2410_p3 = por %p2409_p12, %p2408_p13 }
  0x9f   : > { %p2412_p0 = por %p2411_p9, %p2410_p3 }
  0xa1   : > { %p2413_p2 = pnand %p2412_p0, %p2406_p11 }
  0xa3   : > { %2416 = shalt.err (!%p2413_p2)
}
  0xa4   : > { %s2417_s26 = scalar_lea.vmem %s2898_s9, 128  ;;  %s2598_s30 = smov [#allocation3]  }
  0xa5   : > { %p2418_p10 = scmp.ne.s32.totalorder %s2898_s9, %s2417_s26  ;;  %s2422_s10 = sshll.u32 %s2598_s30, 4  ;;  %s2423_s10 = int_to_ptr.vmem [resolvable:$false] %s2422_s10 }
  0xa6   : > { %s2424_s17 = scalar_lea.vmem %s2423_s10, 256  ;;  %p2425_p4 = scmp.lt.s32.totalorder %s2898_s9, %s2423_s10 }
  0xa7   : > { %p2420_p5 = pnand %p2418_p10, %p2846_p6  ;;  %p2426_p1 = scmp.lt.s32.totalorder %s2424_s17, %s2417_s26 }
  0xa9   : > { %p2421_p7 = pneg %p2420_p5  ;;  %p2427_p8 = por %p2426_p1, %p2425_p4 }
  0xab   : > { %p2428_p13 = pnand %p2427_p8, %p2421_p7 }
  0xad   : > { %2431 = shalt.err (!%p2428_p13)
}
  0xae   : > { %p3249_p11 = scmp.ne.s32.totalorder %s3239_s14, 0  ;;  %s499_s5 = scalar_lea.vmem [#allocation8], %s2816_s28 }
  0xaf   : > { %s506_s24 = sshll.u32 %s499_s5, 4  ;;  %s2934_s16 = scalar_lea.hbm %s3187_s3, %s2819_s12  ;;  %s507_s24 = int_to_ptr.vmem [resolvable:$true] %s506_s24 }
  0xb0   : > { %2177 = dma.hbm_to_vmem [thread:$0]  (!%p3249_p11), %s2874_s1, 128, %s2898_s9, %s459_s13  }
  0xb1   : > { %s2432_s29 = scalar_lea.hbm %s2904_s21, 128  ;;  %s2437_s10 = scalar_lea.hbm %s3186_s2, 256 }
  0xb2   : > { %p2433_p12 = scmp.ne.s32.totalorder %s2904_s21, %s2432_s29  ;;  %p2438_p0 = scmp.lt.u32.totalorder %s2904_s21, %s3186_s2 }
  0xb3   : > { %p2439_p2 = scmp.lt.u32.totalorder %s2437_s10, %s2432_s29  ;;  %p2441_p5 = scmp.lt.u32.totalorder %s2432_s29, %s2904_s21 }
  0xb4   : > { %p2435_p3 = pnand %p2433_p12, %p2846_p6 }
  0xb5   : > { %p2440_p10 = por %p2439_p2, %p2438_p0 }
  0xb6   : > { %p2436_p9 = pneg %p2435_p3 }
  0xb7   : > { %p2442_p7 = por %p2441_p5, %p2440_p10 }
  0xb9   : > { %p2443_p4 = pnand %p2442_p7, %p2436_p9 }
  0xbb   : > { %2446 = shalt.err (!%p2443_p4)
}
  0xbc   : > { %s2447_s1 = scalar_lea.vmem %s507_s24, 128  ;;  %s2599_s12 = smov [#allocation8]  }
  0xbd   : > { %p2448_p1 = scmp.ne.s32.totalorder %s507_s24, %s2447_s1  ;;  %s2452_s9 = sshll.u32 %s2599_s12, 4  ;;  %s2453_s9 = int_to_ptr.vmem [resolvable:$false] %s2452_s9 }
  0xbe   : > { %s2454_s13 = scalar_lea.vmem %s2453_s9, 256  ;;  %p2455_p12 = scmp.lt.s32.totalorder %s507_s24, %s2453_s9 }
  0xbf   : > { %p2450_p8 = pnand %p2448_p1, %p2846_p6  ;;  %p2456_p3 = scmp.lt.s32.totalorder %s2454_s13, %s2447_s1 }
  0xc1   : > { %p2451_p13 = pneg %p2450_p8  ;;  %p2457_p11 = por %p2456_p3, %p2455_p12 }
  0xc3   : > { %p2458_p0 = pnand %p2457_p11, %p2451_p13 }
  0xc5   : > { %2461 = shalt.err (!%p2458_p0)
}
  0xc6   : > { %p3250_p2 = scmp.ne.s32.totalorder %s3239_s14, 0  ;;  %s517_s0 = scalar_lea.vmem [#allocation9], %s2816_s28 }
  0xc7   : > { %s525_s5 = sshll.u32 %s517_s0, 4  ;;  %s3251_s15 = sand.u32 1, %s2590_s22   ;;  %s526_s5 = int_to_ptr.vmem [resolvable:$true] %s525_s5 }
  0xc8   : > { %2183 = dma.hbm_to_vmem [thread:$0]  (!%p3250_p2), %s2904_s21, 128, %s507_s24, %s2840_s4  }
  0xc9   : > { %s514_s11 = scalar_lea.sflag [#allocation10], %s3251_s15  ;;  %s2462_s29 = scalar_lea.hbm %s2934_s16, 128 }
  0xca   : > { %p2463_p11 = scmp.ne.s32.totalorder %s2934_s16, %s2462_s29  ;;  %s2467_s10 = scalar_lea.hbm %s3187_s3, 256 }
  0xcb   : > { %p2468_p5 = scmp.lt.u32.totalorder %s2934_s16, %s3187_s3  ;;  %p2469_p7 = scmp.lt.u32.totalorder %s2467_s10, %s2462_s29 }
  0xcc   : > { %p2465_p9 = pnand %p2463_p11, %p2846_p6  ;;  %p2471_p1 = scmp.lt.u32.totalorder %s2462_s29, %s2934_s16 }
  0xcd   : > { %p2470_p4 = por %p2469_p7, %p2468_p5 }
  0xce   : > { %p2466_p10 = pneg %p2465_p9 }
  0xcf   : > { %p2472_p8 = por %p2471_p1, %p2470_p4 }
  0xd1   : > { %p2473_p13 = pnand %p2472_p8, %p2466_p10 }
  0xd3   : > { %2476 = shalt.err (!%p2473_p13)
}
  0xd4   : > { %s2477_s4 = scalar_lea.vmem %s526_s5, 128  ;;  %s2600_s28 = smov [#allocation9]  }
  0xd5   : > { %p2478_p12 = scmp.ne.s32.totalorder %s526_s5, %s2477_s4  ;;  %s2482_s21 = sshll.u32 %s2600_s28, 4  ;;  %s2483_s21 = int_to_ptr.vmem [resolvable:$false] %s2482_s21 }
  0xd6   : > { %s2484_s24 = scalar_lea.vmem %s2483_s21, 256  ;;  %p2485_p11 = scmp.lt.s32.totalorder %s526_s5, %s2483_s21 }
  0xd7   : > { %p2480_p3 = pnand %p2478_p12, %p2846_p6  ;;  %p2486_p9 = scmp.lt.s32.totalorder %s2484_s24, %s2477_s4 }
  0xd9   : > { %p2481_p0 = pneg %p2480_p3  ;;  %p2487_p2 = por %p2486_p9, %p2485_p11 }
  0xdb   : > { %p2488_p5 = pnand %p2487_p2, %p2481_p0 }
  0xdd   : > { %2491 = shalt.err (!%p2488_p5)
}
  0xde   : > { %p3252_p7 = scmp.ne.s32.totalorder %s3239_s14, 0  ;;  %p3253_p10 = scmp.ne.s32.totalorder %s3230_s27, 0 }
  0xdf   : > { %s2977_s20 = sand.u32 (!%p3253_p10), 1, %s2574_s18   ;;  %p3254_p6 = scmp.ne.s32.totalorder (!%p3253_p10), %s3227_s25, 0 }
  0xe0   : > { %2186 = dma.hbm_to_vmem [thread:$0]  (!%p3252_p7), %s2934_s16, 128, %s526_s5, %s514_s11  }
  0xe1   : > { %534 = sbr.rel (%p3253_p10) target bundleno = 2123 (0x84b), region = 64  ;;  %s2980_s12 = sshll.u32 (!%p3253_p10), %s2977_s20, 3 }
  0xe2   : > { %s537_s9 = scalar_lea.sflag (!%p3253_p10), [#allocation4], %s2977_s20  ;;  %s540_s13 = scalar_lea.vmem (!%p3253_p10), [#allocation3], %s2980_s12 }
  0xe8   : > { %2545 = dma.done.wait (%p3254_p6), %s537_s9, 128  }
  0xe9   : > { %2547 = vsyncadd (%p3254_p6), %s537_s9, 4294967168  ;;  %s545_s27 = sand.u32 1, %s2703_s23   ;;  %s549_s16 = scalar_lea.vmem [#allocation6], %s2980_s12 }
  0xea   : > { %s546_s14 = scalar_lea.sflag [#allocation7], %s545_s27 }
  0xeb   : > { %2549 = dma.done.wait (%p3254_p6), %s546_s14, 256  }
  0xec   : > { %2551 = vsyncadd (%p3254_p6), %s546_s14, 4294967040  ;;  %s558_s0 = scalar_lea.vmem [#allocation8], %s2980_s12  ;;  %s564_s5 = scalar_lea.sflag [#allocation10], %s545_s27 }
  0xed   : > { %s567_s15 = scalar_lea.vmem [#allocation9], %s2980_s12 }
  0xee   : > { %2553 = dma.done.wait (%p3254_p6), %s564_s5, 128  }
  0xef   : > { %2555 = vsyncadd (%p3254_p6), %s564_s5, 4294967168  ;;  %p3255_p2 = scmp.eq.s32.totalorder %s2703_s23, 0 }
  0xf1   : > { %2557 = dma.done.wait (%p3255_p2), [#allocation10], 512   ;;  %p3256_p4 = pmov %p3255_p2 }
  0xf2   : > { %p3257_p1 = pmov %p3255_p2 }
  0xf3   : > { %2559 = vsyncadd (%p3256_p4), [#allocation10], 4294966784 }
  0xf4   : > { %2561 = dma.done.wait (%p3257_p1), [#allocation13], 1024   ;;  %p3258_p8 = pmov %p3257_p1 }
  0xf5   : > { %vm668_vm0 = vcmask 261120   ;;  %v2601_v0 = vmov 0.0|0.0   ;;  %v2602_v1 = vmov 0.0   ;;  %vm2603_vm1 = vmmov 0   ;;  %v657_v2 = vld [vmem:[#allocation12] sm:$0xff]  ;;  %v658_v3 = vld [vmem:[#allocation12 + $0x8] sm:$0xff] }
  0xf6   : > { %2563 = vsyncadd (%p3258_p8), [#allocation13], 4294966272  ;;  %2118 = vmatprep.subr.bf16.mxu0 %v2601_v0  ;;  %2124 = vmatprep.subr.bf16.mxu1 %v2601_v0  ;;  %1691 = vst.msk [vmem:[#allocation2] sm:$0xff] %vm668_vm0, %v2602_v1  ;;  %v742_v4 = vld [vmem:[#allocation14] sm:$0xff]  ;;  %v2119_v5 = vpack.c.bf16 %v658_v3, %v657_v2  ;;  %v743_v6 = vld [vmem:[#allocation14 + $0x8] sm:$0xff]  ;;  %s2604_s23 = smov 96  }
  0xf7   : > { %2042 = vmatprep.mubr.msk.f32.mxu0 %vm2603_vm1, %v2602_v1  ;;  %2053 = vmatprep.mubr.msk.f32.mxu1 %vm2603_vm1, %v2602_v1  ;;  %v659_v7 = vld [vmem:[#allocation12 + $0x10] sm:$0xff]  ;;  %v660_v8 = vld [vmem:[#allocation12 + $0x18] sm:$0xff]  ;;  %v2125_v9 = vpack.c.bf16 %v743_v6, %v742_v4  ;;  %v2262_v12 = vpack.i.bf16 %v743_v6, %v742_v4  ;;  %v656_v16 = vld [vmem:[%s540_s13] sm:$0xff]  ;;  %vm922_vm2 = vcmask 64512   ;;  %s2605_s30 = smov 120   ;;  %s2606_s10 = smov 112  }
  0xf8   : > { %v744_v10 = vld [vmem:[#allocation14 + $0x10] sm:$0xff]  ;;  %v745_v11 = vld [vmem:[#allocation14 + $0x18] sm:$0xff]  ;;  %2120 = vmatpush3.bf16.msra.mxu0 %v2119_v5  ;;  %v2122_v13 = vpack.c.bf16 %v660_v8, %v659_v7  ;;  %v827_v27 = vld [vmem:[%s558_s0] sm:$0xff]  ;;  %s2607_s17 = smov 104   ;;  %s3259_s28 = sld [smem:[#allocation33_spill]]  ;;  %vm1606_vm3 = vcmask 130048  }
  0xf9   : > { %2126 = vmatpush3.bf16.msra.mxu1 %v2125_v9  ;;  %2121 = vmatprep.subr.bf16.mxu0 %v2601_v0  ;;  %v2128_v14 = vpack.c.bf16 %v745_v11, %v744_v10  ;;  %v2267_v15 = vpack.i.bf16 %v745_v11, %v744_v10  ;;  %v747_v17 = vld [vmem:[%s549_s16] sm:$0xff]  ;;  %v921_v43 = vld [vmem:[#allocation11] sm:$0xff]  ;;  %s2608_s16 = smov 8   ;;  %s2609_s0 = smov 16   ;;  %vm1608_vm4 = vcmask 195584  }
  0xfa   : > { %2127 = vmatprep.subr.bf16.mxu1 %v2601_v0  ;;  %2263 = vrot.lane.b32.xlu0 %v2262_v12, %s2604_s23  ;;  %v1977_v18 = vld [vmem:[%s3192_s8] ss:$0 sm:$0xff]  ;;  %v1256_v58 = vld [vmem:[#allocation11 + $0x10] sm:$0xff]  ;;  %s2610_s5 = smov 24   ;;  %s3262_s29 = sld [smem:[#allocation34_spill]] }
  0xfb   : > { %v1975_v28 = vld [vmem:[%s3190_s6] ss:$0 sm:$0xff]  ;;  %s3263_s4 = sld [smem:[#allocation35_spill]]  ;;  %s1709_s24 = scalar_lea.sflag [#allocation5], %s2977_s20 }
  0xfc   : > { %2123 = vmatpush3.bf16.msra.mxu0 %v2122_v13  ;;  %v3065_v47 = vld [vmem:[%s567_s15] sm:$0xff]  ;;  %s3260_s15 = sld [smem:[#allocation23_spill]] }
  0xfd   : > { %2129 = vmatpush3.bf16.msra.mxu1 %v2128_v14  ;;  %2130 = vmatprep.subr.bf16.mxu0 %v2601_v0 }
  0xfe   : > { %2268 = vrot.lane.b32.xlu0 %v2267_v15, %s2604_s23  ;;  %2067 = vmatprep.subr.mxu1 %v2602_v1  ;;  %v1425_v15 = vld [vmem:[#allocation11 + $0x18] sm:$0xff] }
  0xff   : > { %2043 = vmatmul.mubr.msk.f32.vlgmr.msra.gmra.mrb[0].mxu0 %vm668_vm0, %v656_v16 }
 0x100   : > { %2054 = vmatmul.mubr.msk.f32.vlgmr.msra.gmra.mrb[0].mxu1 %vm668_vm0, %v747_v17  ;;  %2064 = vmatprep.mubr.msk.f32.mxu0 %vm2603_vm1, %v2602_v1 }
 0x101   : > { %2069 = vmatprep.mubr.msk.f32.mxu1 %vm2603_vm1, %v2602_v1 }
 0x102   : > { %844 = vrot.lane.b32.xlu0 %v1977_v18, %s2604_s23  ;;  %s3261_s23 = sld [smem:[#allocation27_spill]]  ;;  %s1995_s26 = sshll.u32 %s3260_s15, 7 }
 0x103   : > { %s3134_s21 = scalar_lea.hbm %s3263_s4, %s1995_s26 }
 0x108   : > { %p3264_p12 = scmp.ne.s32.totalorder %s3261_s23, 0 }
 0x16c   : > { %v2264_v19 = vpop.permute.xlu0 %2263 }
 0x16d   : > { %v2266_v20 = vunpack.i.h.bf16 %v2264_v19  ;;  %v2265_v21 = vunpack.i.l.bf16 %v2264_v19 }
 0x16f   : > { %v2131_v22 = vpack.c.bf16 %v2266_v20, %v2265_v21 }
 0x170   : > { %v2269_v23 = vpop.permute.xlu0 %2268 }
 0x171   : > { %v2271_v24 = vunpack.i.h.bf16 %v2269_v23  ;;  %v2270_v25 = vunpack.i.l.bf16 %v2269_v23  ;;  %2132 = vmatpush3.bf16.msra.mxu0 %v2131_v22 }
 0x172   : > { %2133 = vmatprep.subr.bf16.mxu0 %v2601_v0 }
 0x173   : > { %v2134_v26 = vpack.c.bf16 %v2271_v24, %v2270_v25 }
 0x174   : > { %v845_v35 = vpop.permute.xlu0 %844 }
 0x175   : > { %2135 = vmatpush3.bf16.msra.mxu0 %v2134_v26 }
 0x176   : > { %2087 = vmatprep.subr.mxu0 %v2602_v1 }
 0x178   : > { %2065 = vmatmul.mubr.msk.f32.vlgmr.msra.gmra.mrb[2].mxu0 %vm668_vm0, %v827_v27 }
 0x179   : > { %2089 = vmatprep.mubr.msk.f32.mxu0 %vm2603_vm1, %v2602_v1 }
 0x1d2   : > { %v738_v29 = vpop.f32.mrb[0].mxu0 }
 0x1d3   : > { %v739_v30 = vadd.f32 %v1975_v28, %v738_v29  ;;  %v823_v31 = vpop.f32.mrb[0].mxu1  ;;  %v2044_v32 = vpop.f32.mrb[1].mxu0 }
 0x1d4   : > { %v824_v33 = vadd.f32 %v1977_v18, %v823_v31  ;;  %v2055_v34 = vpop.f32.mrb[1].mxu1  ;;  %v1086_v18 = vld [vmem:[#allocation11 + $0x8] sm:$0xff] }
 0x1d5   : > { %1087 = vrot.lane.b32.xlu0 %v739_v30, %s2605_s30 }
 0x1d6   : > { %2068 = vmatpush3.xpose.msk.msra.mxu1 %vm922_vm2, %v824_v33 }
 0x1d7   : > { %2072 = vmatprep.subr.mxu1 %v2602_v1 }
 0x1d9   : > { %2070 = vmatmul.mubr.msk.f32.vlgmr.msra.gmra.mrb[2].mxu1 %vm922_vm2, %v739_v30  ;;  %1259 = vrot.lane.b32.xlu0 %v824_v33, %s2606_s10 }
 0x1da   : > { %2074 = vmatprep.mubr.msk.f32.mxu1 %vm2603_vm1, %v2602_v1 }
 0x1dd   : > { %1257 = vrot.lane.b32.xlu0 %v739_v30, %s2606_s10 }
 0x1e1   : > { %1428 = vrot.lane.b32.xlu0 %v824_v33, %s2607_s17 }
 0x247   : > { %v1088_v36 = vpop.permute.xlu0 %1087 }
 0x24b   : > { %v1260_v37 = vpop.permute.xlu0 %1259  ;;  %v916_v40 = vpop.f32.mrb[2].mxu0 }
 0x24c   : > { %2088 = vmatpush3.xpose.msk.msra.mxu0 %vm922_vm2, %v1260_v37  ;;  %v3059_v41 = vadd.f32 %v916_v40, %v845_v35  ;;  %v2066_v42 = vpop.f32.mrb[3].mxu0 }
 0x24d   : > { %2097 = vmatprep.subr.mxu0 %v2602_v1 }
 0x24e   : > { %2073 = vmatpush3.msra.mxu1 %v3059_v41 }
 0x24f   : > { %v1258_v38 = vpop.permute.xlu0 %1257  ;;  %2077 = vmatprep.subr.mxu1 %v2602_v1 }
 0x250   : > { %2090 = vmatmul.mubr.msk.f32.vlgmr.msra.gmra.mrb[4].mxu0 %vm922_vm2, %v1258_v38 }
 0x251   : > { %2099 = vmatprep.mubr.msk.f32.mxu0 %vm2603_vm1, %v2602_v1 }
 0x253   : > { %v1429_v39 = vpop.permute.xlu0 %1428 }
 0x254   : > { %2098 = vmatpush3.xpose.msk.msra.mxu0 %vm922_vm2, %v1429_v39 }
 0x255   : > { %2136 = vmatprep.subr.bf16.mxu0 %v2601_v0 }
 0x2ac   : > { %v995_v44 = vpop.f32.mrb[2].mxu1 }
 0x2ad   : > { %v996_v45 = vadd.f32 %v995_v44, %v921_v43  ;;  %v2071_v46 = vpop.f32.mrb[3].mxu1 }
 0x2af   : > { %v999_v48 = vmul.f32 0.35355338, %v996_v45 }
 0x2b1   : > { %v1000_v49 = vadd.f32 %v999_v48, %v3065_v47 }
 0x2b3   : > { %v1001_v50 = vsel %vm922_vm2, %v1000_v49, -inf }
 0x2b4   : > { %1002 = vmax.xlane.f32.xlu1 %v1001_v50  ;;  %v1611_v50 = vld [vmem:[%s3259_s28 + $0x8] sm:$0xff] }
 0x323   : > { %v1331_v51 = vpop.f32.mrb[4].mxu0 }
 0x324   : > { %v2091_v52 = vpop.f32.mrb[5].mxu0  ;;  %v1332_v59 = vadd.f32 %v1331_v51, %v1256_v58 }
 0x325   : > { %v1612_v52 = vld [vmem:[%s3259_s28 + $0x10] sm:$0xff] }
 0x326   : > { %v1335_v60 = vmul.f32 0.35355338, %v1332_v59 }
 0x328   : > { %v1336_v61 = vadd.f32 %v1335_v60, %v3065_v47 }
 0x32a   : > { %v1337_v62 = vsel %vm922_vm2, %v1336_v61, -inf }
 0x341   : > { %v1003_v53 = vpop.xlane.xlu1 %1002 }
 0x342   : > { %v1004_v54 = vsub.f32 %v1000_v49, %v1003_v53  ;;  %v1610_v49 = vld [vmem:[%s3259_s28] sm:$0xff] }
 0x343   : > { %v2137_v51 = vpack.c.bf16 %v1611_v50, %v1610_v49 }
 0x344   : > { %v1005_v55 = vmul.f32 1.442695, %v1004_v54 }
 0x346   : > { %2272 = vpow2.f32 %v1005_v55 }
 0x350   : > { %v2273_v56 = vpop.eup %2272 }
 0x351   : > { %v1007_v57 = vsel %vm922_vm2, %v2273_v56, 0.0 }
 0x352   : > { %1008 = vadd.xlane.f32.xlu1 %v1007_v57 }
 0x363   : > { %1089 = vrot.lane.b32.xlu1 %v824_v33, %s2605_s30 }
 0x367   : > { %1426 = vrot.lane.b32.xlu1 %v739_v30, %s2607_s17 }
 0x38b   : > { %1338 = vmax.xlane.f32.xlu1 %v1337_v62 }
 0x3df   : > { %v1009_v63 = vpop.xlane.xlu1 %1008 }
 0x3e0   : > { %2274 = vrcp.f32 %v1009_v63 }
 0x3e3   : > { %v1090_v2 = vpop.permute.xlu1 %1089 }
 0x3e7   : > { %v1427_v3 = vpop.permute.xlu1 %1426 }
 0x3e8   : > { %2100 = vmatmul.mubr.msk.f32.vlgmr.msra.gmra.mrb[6].mxu0 %vm922_vm2, %v1427_v3  ;;  %v1692_v3 = vld [vmem:[#allocation2] sm:$0xff] }
 0x3e9   : > { %2115 = vmatprep.mubr.msk.f32.mxu0 %vm2603_vm1, %v2602_v1  ;;  %2138 = vmatpush3.bf16.msra.mxu0 %v2137_v51 }
 0x3ea   : > { %v2275_v4 = vpop.eup %2274  ;;  %2139 = vmatprep.subr.bf16.mxu0 %v2601_v0 }
 0x3eb   : > { %v1011_v5 = vmul.f32 %v2275_v4, %v2273_v56 }
 0x3ed   : > { %2075 = vmatmul.mubr.msk.f32.vlgmr.msra.gmra.mrb[4].mxu1 %vm922_vm2, %v1011_v5 }
 0x3ee   : > { %2078 = vmatpush3.xpose.msk.msra.mxu1 %vm922_vm2, %v1090_v2  ;;  %2079 = vmatprep.mubr.msk.f32.mxu1 %vm2603_vm1, %v2602_v1 }
 0x3ef   : > { %2082 = vmatprep.subr.mxu1 %v2602_v1 }
 0x3f1   : > { %2080 = vmatmul.mubr.msk.f32.vlgmr.msra.gmra.mrb[6].mxu1 %vm922_vm2, %v1088_v36 }
 0x3f2   : > { %2084 = vmatprep.mubr.msk.f32.mxu1 %vm2603_vm1, %v2602_v1 }
 0x418   : > { %v1339_v6 = vpop.xlane.xlu1 %1338 }
 0x419   : > { %v1340_v7 = vsub.f32 %v1336_v61, %v1339_v6 }
 0x41b   : > { %v1341_v8 = vmul.f32 1.442695, %v1340_v7  ;;  %v1993_v7 = vld [vmem:[%s3262_s29] ss:$0 sm:$0xff] }
 0x41d   : > { %2276 = vpow2.f32 %v1341_v8 }
 0x427   : > { %v2277_v9 = vpop.eup %2276 }
 0x428   : > { %v1343_v10 = vsel %vm922_vm2, %v2277_v9, 0.0 }
 0x429   : > { %1344 = vadd.xlane.f32.xlu1 %v1343_v10 }
 0x43a   : > { %1179 = vrot.lane.b32.xlu1 %v3059_v41, %s2605_s30  ;;  %s643_s30 = scalar_lea.vmem [#allocation15], %s2980_s12  ;;  %s2611_s12 = smov [#allocation15]  }
 0x43b   : > { %s2496_s13 = sshll.u32 %s2611_s12, 4  ;;  %s2497_s13 = int_to_ptr.vmem [resolvable:$false] %s2496_s13 }
 0x43c   : > { %s2498_s27 = scalar_lea.vmem %s2497_s13, 256 }
 0x43e   : > { %1517 = vrot.lane.b32.xlu1 %v3059_v41, %s2607_s17 }
 0x4b6   : > { %v1345_v11 = vpop.xlane.xlu1 %1344 }
 0x4ba   : > { %v1180_v12 = vpop.permute.xlu1 %1179 }
 0x4bb   : > { %2083 = vmatpush3.msra.mxu1 %v1180_v12  ;;  %v1500_v13 = vpop.f32.mrb[6].mxu0 }
 0x4bc   : > { %v2101_v14 = vpop.f32.mrb[7].mxu0  ;;  %2092 = vmatprep.subr.mxu1 %v2602_v1  ;;  %v1501_v19 = vadd.f32 %v1500_v13, %v1425_v15 }
 0x4be   : > { %v1504_v23 = vmul.f32 0.35355338, %v1501_v19 }
 0x4c0   : > { %v3091_v16 = vpop.f32.mrb[4].mxu1  ;;  %v1505_v27 = vadd.f32 %v1504_v23, %v3065_v47 }
 0x4c1   : > { %v2076_v17 = vpop.f32.mrb[5].mxu1 }
 0x4c2   : > { %v1506_v28 = vsel %vm922_vm2, %v1505_v27, -inf }
 0x4c4   : > { %v1161_v20 = vpop.f32.mrb[6].mxu1 }
 0x4c5   : > { %v1162_v21 = vadd.f32 %v1161_v20, %v1086_v18  ;;  %v2081_v22 = vpop.f32.mrb[7].mxu1 }
 0x4c7   : > { %v1165_v24 = vmul.f32 0.35355338, %v1162_v21 }
 0x4c9   : > { %v1166_v25 = vadd.f32 %v1165_v24, %v3065_v47 }
 0x4cb   : > { %v1167_v26 = vsel %vm922_vm2, %v1166_v25, -inf }
 0x4cc   : > { %1168 = vmax.xlane.f32.xlu0 %v1167_v26 }
 0x4d0   : > { %1507 = vmax.xlane.f32.xlu0 %v1506_v28 }
 0x559   : > { %v1169_v29 = vpop.xlane.xlu0 %1168 }
 0x55a   : > { %v1170_v30 = vsub.f32 %v1166_v25, %v1169_v29 }
 0x55c   : > { %v1171_v33 = vmul.f32 1.442695, %v1170_v30 }
 0x55d   : > { %v1508_v31 = vpop.xlane.xlu0 %1507 }
 0x55e   : > { %v1509_v32 = vsub.f32 %v1505_v27, %v1508_v31 }
 0x560   : > { %v1510_v34 = vmul.f32 1.442695, %v1509_v32 }
 0x562   : > { %2278 = vpow2.f32 %v1510_v34 }
 0x563   : > { %2280 = vpow2.f32 %v1171_v33 }
 0x56c   : > { %v2279_v35 = vpop.eup %2278 }
 0x56d   : > { %v1512_v36 = vsel %vm922_vm2, %v2279_v35, 0.0  ;;  %v2281_v37 = vpop.eup %2280 }
 0x56e   : > { %1513 = vadd.xlane.f32.xlu0 %v1512_v36  ;;  %v1173_v38 = vsel %vm922_vm2, %v2281_v37, 0.0 }
 0x572   : > { %1174 = vadd.xlane.f32.xlu0 %v1173_v38 }
 0x588   : > { %1348 = vrot.lane.b32.xlu0 %v3059_v41, %s2606_s10  ;;  %v1518_v41 = vpop.permute.xlu1 %1517  ;;  %s1723_s10 = sshll.u32 %s643_s30, 4  ;;  %s3136_s10 = int_to_ptr.vmem [resolvable:$true] %s1723_s10 }
 0x589   : > { %s2492_s9 = scalar_lea.vmem %s3136_s10, 128  ;;  %p2499_p11 = scmp.lt.s32.totalorder %s3136_s10, %s2497_s13 }
 0x58a   : > { %p2493_p13 = scmp.ne.s32.totalorder %s3136_s10, %s2492_s9  ;;  %p2500_p9 = scmp.lt.s32.totalorder %s2498_s27, %s2492_s9 }
 0x58c   : > { %p2494_p3 = pnand %p2493_p13, %p3264_p12  ;;  %p2501_p5 = por %p2500_p9, %p2499_p11 }
 0x58e   : > { %p2495_p0 = pneg %p2494_p3 }
 0x590   : > { %p2502_p7 = pnand %p2501_p5, %p2495_p0 }
 0x5fb   : > { %v1514_v39 = vpop.xlane.xlu0 %1513 }
 0x5ff   : > { %v1175_v40 = vpop.xlane.xlu0 %1174 }
 0x600   : > { %2282 = vrcp.f32 %v1175_v40 }
 0x601   : > { %2284 = vrcp.f32 %v1345_v11 }
 0x602   : > { %2286 = vrcp.f32 %v1514_v39 }
 0x603   : > { %v1349_v45 = vpop.permute.xlu0 %1348 }
 0x60a   : > { %v2283_v42 = vpop.eup %2282 }
 0x60b   : > { %v1177_v43 = vmul.f32 %v2283_v42, %v2281_v37  ;;  %v2285_v44 = vpop.eup %2284 }
 0x60c   : > { %v1347_v46 = vmul.f32 %v2285_v44, %v2277_v9  ;;  %v2287_v47 = vpop.eup %2286 }
 0x60d   : > { %2085 = vmatmul.mubr.msk.f32.vlgmr.msra.gmra.mrb[8].mxu1 %vm922_vm2, %v1177_v43  ;;  %v1516_v48 = vmul.f32 %v2287_v47, %v2279_v35 }
 0x60e   : > { %2093 = vmatpush3.msra.mxu1 %v1349_v45  ;;  %2094 = vmatprep.mubr.msk.f32.mxu1 %vm2603_vm1, %v2602_v1 }
 0x60f   : > { %2102 = vmatprep.subr.mxu1 %v2602_v1 }
 0x611   : > { %2095 = vmatmul.mubr.msk.f32.vlgmr.msra.gmra.mrb[10].mxu1 %vm922_vm2, %v1347_v46 }
 0x612   : > { %2103 = vmatpush3.msra.mxu1 %v1518_v41  ;;  %2104 = vmatprep.mubr.msk.f32.mxu1 %vm2603_vm1, %v2602_v1  ;;  %v1613_v1 = vld [vmem:[%s3259_s28 + $0x18] sm:$0xff] }
 0x613   : > { %v2140_v53 = vpack.c.bf16 %v1613_v1, %v1612_v52 }
 0x615   : > { %2105 = vmatmul.mubr.msk.f32.vlgmr.msra.gmra.mrb[12].mxu1 %vm922_vm2, %v1516_v48  ;;  %2141 = vmatpush3.bf16.msra.mxu0 %v2140_v53 }
 0x6e0   : > { %v1251_v54 = vpop.f32.mrb[8].mxu1 }
 0x6e1   : > { %1594 = vrot.lane.b32.xlu1 %v1251_v54, %s2608_s16  ;;  %v2086_v55 = vpop.f32.mrb[9].mxu1 }
 0x6e4   : > { %v1420_v56 = vpop.f32.mrb[10].mxu1 }
 0x6e5   : > { %1598 = vrot.lane.b32.xlu0 %v1420_v56, %s2609_s0  ;;  %v2096_v57 = vpop.f32.mrb[11].mxu1 }
 0x6e8   : > { %v1589_v58 = vpop.f32.mrb[12].mxu1 }
 0x6e9   : > { %1602 = vrot.lane.b32.xlu1 %v1589_v58, %s2610_s5  ;;  %v2106_v0 = vpop.f32.mrb[13].mxu1 }
 0x753   : > { %v1595_v59 = vpop.permute.xlu1 %1594 }
 0x754   : > { %v1605_v61 = vsel %vm922_vm2, %v3091_v16, %v1595_v59 }
 0x757   : > { %v1599_v60 = vpop.permute.xlu0 %1598 }
 0x758   : > { %v1607_v62 = vsel %vm1606_vm3, %v1605_v61, %v1599_v60 }
 0x75b   : > { %v1603_v63 = vpop.permute.xlu1 %1602 }
 0x75c   : > { %v1609_v2 = vsel %vm1608_vm4, %v1607_v62, %v1603_v63 }
 0x75d   : > { %2116 = vmatmul.mubr.msk.f32.vlgmr.msra.gmra.mrb[8].mxu0 %vm668_vm0, %v1609_v2 }
 0x830   : > { %v1683_v4 = vpop.f32.mrb[8].mxu0 }
 0x831   : > { %v1693_v5 = vadd.f32 %v1692_v3, %v1683_v4  ;;  %v2117_v6 = vpop.f32.mrb[9].mxu0 }
 0x833   : > { %1694 = vst.msk [vmem:[#allocation2] sm:$0xff] %vm668_vm0, %v1693_v5 }
 0x83a   : > { %v1698_v8 = vld [vmem:[#allocation2] sm:$0xff] }
 0x83b   : > { %v1706_v9 = vadd.f32 %v1993_v7, %v1698_v8 }
 0x83d   : > { %1707 = vst.msk [vmem:[%s643_s30] sm:$0xff] %vm668_vm0, %v1706_v9 }
 0x83e   : > { %2505 = shalt.err (!%p2502_p7)
}
 0x83f   : > { %s2506_s20 = scalar_lea.hbm %s3134_s21, 128  ;;  %s2510_s0 = scalar_lea.hbm %s3263_s4, 256 }
 0x840   : > { %p2507_p10 = scmp.ne.s32.totalorder %s3134_s21, %s2506_s20  ;;  %p2511_p4 = scmp.lt.u32.totalorder %s3134_s21, %s3263_s4 }
 0x841   : > { %p2512_p1 = scmp.lt.u32.totalorder %s2510_s0, %s2506_s20  ;;  %p2514_p13 = scmp.lt.u32.totalorder %s2506_s20, %s3134_s21 }
 0x842   : > { %p2508_p6 = pnand %p2507_p10, %p3264_p12 }
 0x843   : > { %p2513_p8 = por %p2512_p1, %p2511_p4 }
 0x844   : > { %p2509_p2 = pneg %p2508_p6 }
 0x845   : > { %p2515_p3 = por %p2514_p13, %p2513_p8 }
 0x847   : > { %p2516_p0 = pnand %p2515_p3, %p2509_p2 }
 0x849   : > { %2519 = shalt.err (!%p2516_p0)
}
 0x84a   : > { %2162 = dma.vmem_to_hbm [thread:$0]  (%p3264_p12), %s3136_s10, 128, %s3134_s21, %s1709_s24  }
 0x84b PF: > { %s3265_s25 = sld [smem:[#allocation22_spill]]  ;;  %s3266_s11 = sld [smem:[#allocation25_spill]] }
 0x84c   : > { %p3268_p9 = scmp.ge.s32.totalorder %s2590_s22, 2 }
 0x851   : > { %s1735_s29 = sand.u32 1, %s3265_s25   ;;  %p3267_p11 = scmp.ne.s32.totalorder %s3266_s11, 0 }
 0x852   : > { %s1736_s26 = scalar_lea.sflag [#allocation5], %s1735_s29 }
 0x853   : > { %p2188_p5 = pnand %p3268_p9, %p3267_p11 }
 0x855   : > { %2565 = dma.done.wait (!%p2188_p5), %s1736_s26, 128  }
 0x856   : > { %2567 = vsyncadd (!%p2188_p5), %s1736_s26, 4294967168  ;;  %s34_s22 = sadd.s32 1, %s2590_s22   ;;  %s3269_s23 = sld [smem:[#allocation28_spill]] }
 0x857   : > { %p31_p7 = scmp.ge.s32.totalorder %s34_s22, 4   ;;  %s3270_s20 = sld [smem:[#allocation24_spill]] }
 0x858   : > { %s3271_s21 = sld [smem:[#allocation26_spill]]  ;;  %s3272_s17 = smov %s2574_s18 }
 0x859   : > { %s3273_s18 = smov %s2578_s19  ;;  %33 = sbr.rel (!%p31_p7) target bundleno = 19 (0x13), region = 181 }
 0x85c   : > { %s3274_s19 = smov %s3269_s23 }
 0x860   :  { %1741 = vsyncpa [#allocation4], 1 }
 0x861   :  { %1743 = vsyncpa [#allocation4 + $0x1], 1 }
 0x862   :  { %1744 = vsyncpa [#allocation7], 1 }
 0x863   :  { %1746 = vsyncpa [#allocation7 + $0x1], 1 }
 0x864   :  { %1747 = vsyncpa [#allocation10], 1 }
 0x865   :  { %1749 = vsyncpa [#allocation10 + $0x1], 1 }
 0x866   :  { %1750 = vsyncpa [#allocation13], 1 }
 0x867   :  { %1751 = vsyncpa [#allocation5], 1 }
 0x868   :  { %1753 = vsyncpa [#allocation5 + $0x1], 1 }

</bundles_post_ra>
